<compile_context>
chip_gen: v5e
topology: v5e:2x2
jax: 0.10.0
libtpu: 0.0.40
codegen_flags: <defaults>
</compile_context>

<pallas_src>
import jax
import jax.numpy as jnp
from jax.experimental import pallas as pl
from jax.experimental.pallas import tpu as pltpu

_HIGHEST = jax.lax.Precision.HIGHEST


def _attention_kernel(x_ref, wblk_ref, b_ref, bcast_ref, gather_ref, o_ref):
    # x_ref:      (TB, S*F)  lane-dense flat tile of x
    # wblk_ref:   (S*F, S)   block-diagonal weights: wblk[s*F+f, s] = W[f]
    # b_ref:      (1, S)     bias
    # bcast_ref:  (S, S*F)   0/1 selector: bcast[s, s*F+f] = 1   (a -> flat layout)
    # gather_ref: (S*F, F)   0/1 selector: gather[s*F+f, f] = 1  (segmented F-sum)
    # o_ref:      (TB, F)
    xs = x_ref[...].astype(jnp.float32)                             # (TB, S*F)
    # TODO(synk): if production x is bf16 (v6e/v7x), keep the xs * a_flat
    # multiply in bf16 (2x VALU throughput) and only accumulate in f32.

    # eij = tanh(x @ W + b): the per-step reduce over F runs on the idle MXU
    # via the block-diagonal matrix; the big tile never leaves its dense layout.
    eij = jnp.tanh(
        jnp.dot(xs, wblk_ref[...], preferred_element_type=jnp.float32,
                precision=_HIGHEST) + b_ref[...])                   # (TB, S)

    # a = exp(eij); a = a / sum_S(a) + 1e-10 (epsilon after the divide, exactly
    # as in the PyTorch module). Exact divide: denom is only (TB, 1).
    a = jnp.exp(eij)
    a = a / jnp.sum(a, axis=-1, keepdims=True) + 1e-10              # (TB, S)

    # Broadcast `a` back to the flat (TB, S*F) lane layout on the MXU (no
    # cross-lane relayout), then do the weighted sum over S as another
    # segmented reduce on the MXU.
    a_flat = jnp.dot(a, bcast_ref[...], preferred_element_type=jnp.float32,
                     precision=_HIGHEST)                             # (TB, S*F)
    out = jnp.dot(xs * a_flat, gather_ref[...],
                  preferred_element_type=jnp.float32, precision=_HIGHEST)
    o_ref[...] = out.astype(o_ref.dtype)                            # (TB, F)


def _round_up(x, m):
    return ((x + m - 1) // m) * m


def _tpu_defaults():
    """Per-generation tile / VMEM budget. v7x: 2 TCs, 64 MiB VMEM per TC."""
    kind = ""
    try:
        kind = jax.devices()[0].device_kind.lower()
    except Exception:
        pass
    if "v7" in kind or "tpu7" in kind:
        # Bigger tiles to amortize the ~0.35us/step overhead at 3.2 TB/s,
        # but keep 2x tile + temps + constants under ~48 MiB (64 MiB physical).
        return {"num_tc": 2, "target_bytes": 12 << 20, "vmem_limit": 48 << 20}
    # v5e / v6e: single TensorCore, 128 MiB physical VMEM.
    return {"num_tc": 1, "target_bytes": 8 << 20, "vmem_limit": 40 << 20}


def _choose_batch_tile(B, S, F, itemsize, num_tc, target_bytes):
    """Rows of x per grid step, sized against the *padded* VMEM footprint."""
    sub = 8 if itemsize >= 4 else 16
    # Per batch row: flat x block (lane dim S*F padded to 128) + output row
    # (lane dim F padded to 128). Double-buffering and f32 temporaries are
    # covered by the margin between target_bytes and vmem_limit.
    row_bytes = (_round_up(S * F, 128) + _round_up(F, 128)) * itemsize
    cap = max(sub, (target_bytes // row_bytes) // sub * sub)
    if num_tc > 1:
        # Ensure >= num_tc grid steps once the batch is big enough so both
        # v7x TensorCores get a share of the (parallel) batch axis.
        cap = min(cap, max(sub, _round_up(pl.cdiv(B, num_tc), sub)))
    if cap >= B:
        return B          # whole batch in one exact block (no forced split on 1-TC chips)
    return cap


def attention_forward(x, weight, bias, *, tile_rows=None):
    """x: (B, S, F); weight: (F, 1); bias: (S,)  ->  (B, F)."""
    B, S, F = x.shape
    itemsize = x.dtype.itemsize
    cfg = _tpu_defaults()

    if tile_rows is None:
        tb = _choose_batch_tile(B, S, F, itemsize, cfg["num_tc"], cfg["target_bytes"])
    else:
        tb = B if tile_rows >= B else max(8, (tile_rows // 8) * 8)
    grid_b = pl.cdiv(B, tb)   # trailing partial block is masked by Pallas; no jnp.pad copy

    # Lane-dense streaming view of x (S*F = 256 here, a multiple of 128).
    x_flat = x.reshape(B, S * F)

    # Small constant matrices (VMEM-resident, built once outside the kernel).
    seg = jnp.repeat(jnp.arange(S), F)                               # flat j -> step s
    feat = jnp.tile(jnp.arange(F), S)                                # flat j -> feature f
    w_flat = jnp.tile(weight.reshape(-1).astype(jnp.float32), S)     # (S*F,)
    step_oh = jax.nn.one_hot(seg, S, dtype=jnp.float32)              # (S*F, S)
    wblk = step_oh * w_flat[:, None]                                 # (S*F, S)
    bcast = step_oh.T                                                # (S, S*F)
    gather = jax.nn.one_hot(feat, F, dtype=jnp.float32)              # (S*F, F)
    b_row = bias.reshape(1, S).astype(jnp.float32)                   # (1, S)

    return pl.pallas_call(
        _attention_kernel,
        out_shape=jax.ShapeDtypeStruct((B, F), x.dtype),
        grid=(grid_b,),
        in_specs=[
            pl.BlockSpec((tb, S * F), lambda i: (i, 0)),   # streamed lane-dense x tile
            pl.BlockSpec((S * F, S), lambda i: (0, 0)),    # VMEM-resident Wblk
            pl.BlockSpec((1, S), lambda i: (0, 0)),        # VMEM-resident bias
            pl.BlockSpec((S, S * F), lambda i: (0, 0)),    # VMEM-resident bcast selector
            pl.BlockSpec((S * F, F), lambda i: (0, 0)),    # VMEM-resident gather selector
        ],
        out_specs=pl.BlockSpec((tb, F), lambda i: (i, 0)),
        compiler_params=pltpu.CompilerParams(
            dimension_semantics=("parallel",),             # megacore split on v7x
            vmem_limit_bytes=cfg["vmem_limit"],
        ),
    )(x_flat, wblk, b_row, bcast, gather)


def _reference(x, weight, bias):
    # Pure-JAX reference, exact f32 (no MXU), matching the torch module.
    eij = jnp.tanh(jnp.sum(x * weight.reshape(1, 1, -1), axis=-1) + bias[None, :])
    a = jnp.exp(eij)
    a = a / jnp.sum(a, axis=1, keepdims=True) + 1e-10
    return jnp.sum(x * a[..., None], axis=1)


if __name__ == "__main__":
    # Small shapes consistent with the module: step_dim=8, feature_dim=32.
    S, F = 8, 32
    key = jax.random.PRNGKey(0)
    kx, kw, kb, kx2, kx3 = jax.random.split(key, 5)

    # Parameters as in Attention.__init__: weight (F, 1) xavier_uniform_;
    # bias made (small, deterministic) nonzero to exercise the bias add.
    bound = (6.0 / (F + 1)) ** 0.5
    weight = jax.random.uniform(kw, (F, 1), jnp.float32, -bound, bound)
    bias = 0.1 * jax.random.normal(kb, (S,), jnp.float32)

    # 1) Tiny batch: single exact block.
    x = jax.random.normal(kx, (2, S, F), jnp.float32)
    out = jax.block_until_ready(attention_forward(x, weight, bias))
    ref = _reference(x, weight, bias)
    assert out.shape == (2, F)
    assert jnp.allclose(out, ref, atol=1e-4, rtol=1e-4), float(jnp.max(jnp.abs(out - ref)))

    # 2) Larger batch (auto tile choice).
    x2 = jax.random.normal(kx2, (24, S, F), jnp.float32)
    out2 = jax.block_until_ready(attention_forward(x2, weight, bias))
    ref2 = _reference(x2, weight, bias)
    assert out2.shape == (24, F)
    assert jnp.allclose(out2, ref2, atol=1e-4, rtol=1e-4), float(jnp.max(jnp.abs(out2 - ref2)))

    # 3) Forced small tile: multi-step grid with a masked partial trailing block
    #    (B=20, TB=8 -> grid=3, last block has 4 valid rows, no jnp.pad).
    x3 = jax.random.normal(kx3, (20, S, F), jnp.float32)
    out3 = jax.block_until_ready(attention_forward(x3, weight, bias, tile_rows=8))
    ref3 = _reference(x3, weight, bias)
    assert out3.shape == (20, F)
    assert jnp.allclose(out3, ref3, atol=1e-4, rtol=1e-4), float(jnp.max(jnp.abs(out3 - ref3)))

    # TODO(synk): the optional `mask` argument and the dynamic `step_dim`
    # override of forward() are not implemented (static-shape kernel).
    print("KERNEL_OK")
</pallas_src>

<mosaic_0001>
module attributes {stable_mosaic.version = 11 : i64} {
  func.func @_attention_kernel(%arg0: i32, %arg1: memref<2x256xf32, #tpu.memory_space<vmem>>, %arg2: memref<256x8xf32, #tpu.memory_space<vmem>>, %arg3: memref<1x8xf32, #tpu.memory_space<vmem>>, %arg4: memref<8x256xf32, #tpu.memory_space<vmem>>, %arg5: memref<256x32xf32, #tpu.memory_space<vmem>>, %arg6: memref<2x32xf32, #tpu.memory_space<vmem>>) attributes {dimension_semantics = [#tpu.dimension_semantics<parallel>], iteration_bounds = array<i64: 1>, scalar_prefetch = 0 : i64, scratch_operands = 0 : i64, tpu.core_type = #tpu.core_type<tc>, window_params = [{transform_indices = @transform_0, window_bounds = array<i64: 2, 256>}, {pipeline_mode = #tpu.pipeline_mode<synchronous>, transform_indices = @transform_1, window_bounds = array<i64: 256, 8>}, {pipeline_mode = #tpu.pipeline_mode<synchronous>, transform_indices = @transform_2, window_bounds = array<i64: 1, 8>}, {pipeline_mode = #tpu.pipeline_mode<synchronous>, transform_indices = @transform_3, window_bounds = array<i64: 8, 256>}, {pipeline_mode = #tpu.pipeline_mode<synchronous>, transform_indices = @transform_4, window_bounds = array<i64: 256, 32>}, {transform_indices = @transform_5, window_bounds = array<i64: 2, 32>}]} {
    %c0 = arith.constant 0 : index
    %c0_0 = arith.constant 0 : index
    %0 = vector.load %arg1[%c0, %c0_0] : memref<2x256xf32, #tpu.memory_space<vmem>>, vector<2x256xf32>
    %c0_1 = arith.constant 0 : index
    %c0_2 = arith.constant 0 : index
    %1 = vector.load %arg2[%c0_1, %c0_2] : memref<256x8xf32, #tpu.memory_space<vmem>>, vector<256x8xf32>
    %cst = arith.constant dense<0.000000e+00> : vector<2x8xf32>
    %2 = tpu.matmul %0, %1, %cst {dimension_numbers = #tpu.dot_dimension_numbers<[1], [0], [0], [1], [0, 0, 1, 1], [], []>, precision = #tpu.contract_precision<fp32>} : vector<2x256xf32>, vector<256x8xf32>, vector<2x8xf32> -> vector<2x8xf32>
    %c0_3 = arith.constant 0 : index
    %c0_4 = arith.constant 0 : index
    %3 = vector.load %arg3[%c0_3, %c0_4] : memref<1x8xf32, #tpu.memory_space<vmem>>, vector<1x8xf32>
    %4 = vector.broadcast %3 : vector<1x8xf32> to vector<2x8xf32>
    %5 = arith.addf %2, %4 : vector<2x8xf32>
    %6 = math.tanh %5 : vector<2x8xf32>
    %7 = math.exp %6 : vector<2x8xf32>
    %cst_5 = arith.constant dense<0.000000e+00> : vector<2xf32>
    %8 = vector.multi_reduction <add>, %7, %cst_5 [1] : vector<2x8xf32> to vector<2xf32>
    %9 = vector.shape_cast %8 : vector<2xf32> to vector<2x1xf32>
    %10 = vector.broadcast %9 : vector<2x1xf32> to vector<2x8xf32>
    %11 = arith.divf %7, %10 : vector<2x8xf32>
    %cst_6 = arith.constant 1.000000e-10 : f32
    %12 = vector.broadcast %cst_6 : f32 to vector<2x8xf32>
    %13 = arith.addf %11, %12 : vector<2x8xf32>
    %c0_7 = arith.constant 0 : index
    %c0_8 = arith.constant 0 : index
    %14 = vector.load %arg4[%c0_7, %c0_8] : memref<8x256xf32, #tpu.memory_space<vmem>>, vector<8x256xf32>
    %cst_9 = arith.constant dense<0.000000e+00> : vector<2x256xf32>
    %15 = tpu.matmul %13, %14, %cst_9 {dimension_numbers = #tpu.dot_dimension_numbers<[1], [0], [0], [1], [0, 0, 1, 1], [], []>, precision = #tpu.contract_precision<fp32>} : vector<2x8xf32>, vector<8x256xf32>, vector<2x256xf32> -> vector<2x256xf32>
    %16 = arith.mulf %0, %15 : vector<2x256xf32>
    %c0_10 = arith.constant 0 : index
    %c0_11 = arith.constant 0 : index
    %17 = vector.load %arg5[%c0_10, %c0_11] : memref<256x32xf32, #tpu.memory_space<vmem>>, vector<256x32xf32>
    %cst_12 = arith.constant dense<0.000000e+00> : vector<2x32xf32>
    %18 = tpu.matmul %16, %17, %cst_12 {dimension_numbers = #tpu.dot_dimension_numbers<[1], [0], [0], [1], [0, 0, 1, 1], [], []>, precision = #tpu.contract_precision<fp32>} : vector<2x256xf32>, vector<256x32xf32>, vector<2x32xf32> -> vector<2x32xf32>
    %c0_13 = arith.constant 0 : index
    %c0_14 = arith.constant 0 : index
    %19 = vector.load %arg6[%c0_13, %c0_14] : memref<2x32xf32, #tpu.memory_space<vmem>>, vector<2x32xf32>
    tpu.vector_store %arg6[%c0_13, %c0_14], %18 {strides = array<i32>} : memref<2x32xf32, #tpu.memory_space<vmem>>, vector<2x32xf32>,
    return
  }
  func.func @transform_0(%arg0: i32) -> (i32, i32) {
    %c0_i32 = arith.constant 0 : i32
    %c0_i32_0 = arith.constant 0 : i32
    return %arg0, %c0_i32 : i32, i32
  }
  func.func @transform_1(%arg0: i32) -> (i32, i32) {
    %c0_i32 = arith.constant 0 : i32
    %c0_i32_0 = arith.constant 0 : i32
    %c0_i32_1 = arith.constant 0 : i32
    return %c0_i32, %c0_i32_0 : i32, i32
  }
  func.func @transform_2(%arg0: i32) -> (i32, i32) {
    %c0_i32 = arith.constant 0 : i32
    %c0_i32_0 = arith.constant 0 : i32
    %c0_i32_1 = arith.constant 0 : i32
    return %c0_i32, %c0_i32_0 : i32, i32
  }
  func.func @transform_3(%arg0: i32) -> (i32, i32) {
    %c0_i32 = arith.constant 0 : i32
    %c0_i32_0 = arith.constant 0 : i32
    %c0_i32_1 = arith.constant 0 : i32
    return %c0_i32, %c0_i32_0 : i32, i32
  }
  func.func @transform_4(%arg0: i32) -> (i32, i32) {
    %c0_i32 = arith.constant 0 : i32
    %c0_i32_0 = arith.constant 0 : i32
    %c0_i32_1 = arith.constant 0 : i32
    return %c0_i32, %c0_i32_0 : i32, i32
  }
  func.func @transform_5(%arg0: i32) -> (i32, i32) {
    %c0_i32 = arith.constant 0 : i32
    %c0_i32_0 = arith.constant 0 : i32
    return %arg0, %c0_i32 : i32, i32
  }
}

</mosaic_0001>

<bundles_post_ra>
// kernel: tpu_custom_call.1
= control target key start
LH: loop header
LB: loop body
LE: loop exit
PB: predicated region body
PF: predicated region fallthrough
CT: control target
= control target key end

     0   :  { %s3094_s0 = inlined_call_operand.vmem [shape: f32[2,256], index: 0, kind: input, shape index: {}]   ;;  %s3095_s1 = inlined_call_operand.vmem [shape: f32[256,8], index: 1, kind: input, shape index: {}]   ;;  %s3096_s2 = inlined_call_operand.vmem [shape: f32[1,8], index: 2, kind: input, shape index: {}]   ;;  %s3097_s3 = inlined_call_operand.vmem [shape: f32[8,256], index: 3, kind: input, shape index: {}]   ;;  %s3098_s4 = inlined_call_operand.vmem [shape: f32[256,32], index: 4, kind: input, shape index: {}]   ;;  %s3099_s5 = inlined_call_operand.hbm [shape: f32[2,32], index: 5, kind: output, shape index: {}]  }
   0x1   :  { %v37_v0 = vld [vmem:[%s3095_s1 + $0x78] sm:$0xff]  ;;  %v36_v1 = vld [vmem:[%s3095_s1 + $0x70] sm:$0xff]  ;;  %v35_v2 = vld [vmem:[%s3095_s1 + $0x68] sm:$0xff] }
   0x2   :  { %v1886_v3 = vand.u32 4294901760, %v37_v0  ;;  %v1888_v4 = vand.u32 4294901760, %v36_v1  ;;  %v1890_v5 = vand.u32 4294901760, %v35_v2  ;;  %v34_v6 = vld [vmem:[%s3095_s1 + $0x60] sm:$0xff]  ;;  %v33_v7 = vld [vmem:[%s3095_s1 + $0x58] sm:$0xff]  ;;  %v32_v8 = vld [vmem:[%s3095_s1 + $0x50] sm:$0xff] }
   0x3   :  { %v1901_v9 = vand.u32 4294901760, %v34_v6  ;;  %v1903_v10 = vand.u32 4294901760, %v33_v7  ;;  %v1905_v11 = vand.u32 4294901760, %v32_v8  ;;  %v31_v12 = vld [vmem:[%s3095_s1 + $0x48] sm:$0xff]  ;;  %v30_v13 = vld [vmem:[%s3095_s1 + $0x40] sm:$0xff]  ;;  %v29_v21 = vld [vmem:[%s3095_s1 + $0x38] sm:$0xff] }
   0x4   :  { %65 = vmatpush.msra.mxu0 %v1886_v3  ;;  %v1915_v14 = vsub.f32 %v37_v0, %v1886_v3  ;;  %v1918_v15 = vsub.f32 %v36_v1, %v1888_v4  ;;  %261 = vmatpush.msra.mxu3 %v1886_v3  ;;  %v1922_v16 = vsub.f32 %v35_v2, %v1890_v5  ;;  %v1924_v17 = vand.u32 4294901760, %v31_v12  ;;  %v28_v26 = vld [vmem:[%s3095_s1 + $0x30] sm:$0xff]  ;;  %v27_v36 = vld [vmem:[%s3095_s1 + $0x28] sm:$0xff] }
   0x5   :  { %v1927_v18 = vsub.f32 %v34_v6, %v1901_v9  ;;  %v1930_v19 = vsub.f32 %v33_v7, %v1903_v10  ;;  %v1933_v20 = vsub.f32 %v32_v8, %v1905_v11  ;;  %v1943_v25 = vand.u32 4294901760, %v30_v13 }
   0x6   :  { %67 = vmatpush.msra.mxu0 %v1888_v4  ;;  %208 = vmatpush.msra.mxu2 %v1915_v14  ;;  %v107_v22 = vand.u32 4294901760, %v1915_v14  ;;  %v3114_v23 = vand.u32 4294901760, %v1918_v15  ;;  %v3113_v24 = vand.u32 4294901760, %v1922_v16  ;;  %v1952_v29 = vsub.f32 %v31_v12, %v1924_v17 }
   0x7   :  { %263 = vmatpush.msra.mxu3 %v1888_v4  ;;  %v3110_v27 = vand.u32 4294901760, %v1927_v18  ;;  %v3108_v28 = vand.u32 4294901760, %v1930_v19  ;;  %v1965_v33 = vand.u32 4294901760, %v29_v21  ;;  %v1968_v34 = vand.u32 4294901760, %v28_v26 }
   0x8   :  { %69 = vmatpush.msra.mxu0 %v1890_v5  ;;  %211 = vmatpush.msra.mxu2 %v1918_v15  ;;  %v108_v30 = vsub.f32 %v1915_v14, %v107_v22  ;;  %v114_v31 = vsub.f32 %v1918_v15, %v3114_v23  ;;  %v120_v32 = vsub.f32 %v1922_v16, %v3113_v24  ;;  %v3107_v35 = vand.u32 4294901760, %v1933_v20 }
   0x9   :  { %265 = vmatpush.msra.mxu3 %v1890_v5 }
   0xa   :  { %10 = vsyncpa [#allocation3], 0  ;;  %71 = vmatpush.msra.mxu0 %v1901_v9  ;;  %v109_v37 = vand.u32 4294901760, %v108_v30  ;;  %214 = vmatpush.msra.mxu2 %v1922_v16  ;;  %v115_v38 = vand.u32 4294901760, %v114_v31  ;;  %v126_v39 = vsub.f32 %v1927_v18, %v3110_v27  ;;  %v1980_v40 = vsub.f32 %v30_v13, %v1943_v25  ;;  %v26_v42 = vld [vmem:[%s3095_s1 + $0x20] sm:$0xff]  ;;  %v25_v47 = vld [vmem:[%s3095_s1 + $0x18] sm:$0xff] }
   0xb   :  { %267 = vmatpush.msra.mxu3 %v1901_v9  ;;  %v132_v41 = vsub.f32 %v1930_v19, %v3108_v28  ;;  %v121_v43 = vand.u32 4294901760, %v120_v32  ;;  %v1990_v44 = vand.u32 4294901760, %v27_v36  ;;  %v3106_v45 = vand.u32 4294901760, %v1952_v29  ;;  %v24_v54 = vld [vmem:[%s3095_s1 + $0x10] sm:$0xff]  ;;  %v2021_v55 = vld [vmem:[%s3094_s0] sm:$0xf] }
   0xc   :  { %73 = vmatpush.msra.mxu0 %v1903_v10  ;;  %110 = vmatpush.msra.mxu1 %v109_v37  ;;  %v1994_v46 = vsub.f32 %v29_v21, %v1965_v33  ;;  %v138_v48 = vsub.f32 %v1933_v20, %v3107_v35  ;;  %v127_v49 = vand.u32 4294901760, %v126_v39  ;;  %v2005_v50 = vand.u32 4294901760, %v26_v42  ;;  %3132 = vst [vmem:[#allocation5_spill] sm:$0xff] %v2021_v55  ;;  %v53_v60 = vld [vmem:[%s3095_s1 + $0xf8] sm:$0xff]  ;;  %v23_v62 = vld [vmem:[%s3095_s1 + $0x8] sm:$0xff]  ;;  %v22_v6 = vld [vmem:[%s3095_s1] sm:$0xff] }
   0xd   :  { %217 = vmatpush.msra.mxu2 %v1927_v18  ;;  %269 = vmatpush.msra.mxu3 %v1903_v10  ;;  %v3105_v51 = vand.u32 4294901760, %v1980_v40  ;;  %v2009_v52 = vsub.f32 %v28_v26, %v1968_v34  ;;  %v2013_v53 = vand.u32 4294901760, %v25_v47  ;;  %v133_v56 = vand.u32 4294901760, %v132_v41  ;;  %59 = vst [vmem:[#allocation1] ss:$4 sm:$0xff] %v2021_v55  ;;  %v52_v7 = vld [vmem:[%s3095_s1 + $0xf0] sm:$0xff] }
   0xe   :  { %75 = vmatpush.msra.mxu0 %v1905_v11  ;;  %116 = vmatpush.msra.mxu1 %v115_v38  ;;  %v144_v57 = vsub.f32 %v1952_v29, %v3106_v45  ;;  %v3104_v58 = vand.u32 4294901760, %v1994_v46  ;;  %v2029_v59 = vsub.f32 %v27_v36, %v1990_v44  ;;  %v139_v61 = vand.u32 4294901760, %v138_v48  ;;  %v51_v36 = vld [vmem:[%s3095_s1 + $0xe8] sm:$0xff]  ;;  %v46_v35 = vld [vmem:[%s3095_s1 + $0xc0] sm:$0xff]  ;;  %s1803_s19 = sshll.u32 %s3099_s5, 4  ;;  %s1804_s19 = int_to_ptr.hbm [resolvable:$true] %s1803_s19 }
   0xf   :  { %220 = vmatpush.msra.mxu2 %v1930_v19  ;;  %271 = vmatpush.msra.mxu3 %v1905_v11  ;;  %v150_v63 = vsub.f32 %v1980_v40, %v3105_v51  ;;  %v2044_v0 = vand.u32 4294901760, %v24_v54  ;;  %v3102_v1 = vand.u32 4294901760, %v2009_v52  ;;  %v2048_v2 = vsub.f32 %v26_v42, %v2005_v50 }
  0x10   :  { %77 = vmatpush.msra.mxu0 %v1924_v17  ;;  %122 = vmatpush.msra.mxu1 %v121_v43  ;;  %v2059_v8 = vsub.f32 %v25_v47, %v2013_v53  ;;  %v2061_v12 = vand.u32 4294901760, %v53_v60  ;;  %v145_v13 = vand.u32 4294901760, %v144_v57  ;;  %v156_v21 = vsub.f32 %v1994_v46, %v3104_v58  ;;  %v50_v47 = vld [vmem:[%s3095_s1 + $0xe0] sm:$0xff] }
  0x11   :  { %223 = vmatpush.msra.mxu2 %v1933_v20  ;;  %273 = vmatpush.msra.mxu3 %v1924_v17  ;;  %v2067_v26 = vand.u32 4294901760, %v23_v62  ;;  %v3101_v30 = vand.u32 4294901760, %v2029_v59  ;;  %v2072_v31 = vand.u32 4294901760, %v22_v6  ;;  %v2074_v32 = vand.u32 4294901760, %v52_v7 }
  0x12   :  { %79 = vmatpush.msra.mxu0 %v1943_v25  ;;  %128 = vmatpush.msra.mxu1 %v127_v49  ;;  %v151_v37 = vand.u32 4294901760, %v150_v63  ;;  %v162_v38 = vsub.f32 %v2009_v52, %v3102_v1  ;;  %v3100_v39 = vand.u32 4294901760, %v2048_v2  ;;  %v2085_v41 = vsub.f32 %v24_v54, %v2044_v0 }
  0x13   :  { %226 = vmatpush.msra.mxu2 %v1952_v29  ;;  %275 = vmatpush.msra.mxu3 %v1943_v25  ;;  %v3103_v42 = vand.u32 4294901760, %v2059_v8  ;;  %v2091_v43 = vsub.f32 %v53_v60, %v2061_v12  ;;  %v157_v48 = vand.u32 4294901760, %v156_v21  ;;  %v168_v49 = vsub.f32 %v2029_v59, %v3101_v30 }
  0x14   :  { %81 = vmatpush.msra.mxu0 %v1965_v33  ;;  %134 = vmatpush.msra.mxu1 %v133_v56  ;;  %v2101_v54 = vsub.f32 %v23_v62, %v2067_v26  ;;  %v2103_v56 = vand.u32 4294901760, %v51_v36  ;;  %v2108_v57 = vsub.f32 %v22_v6, %v2072_v31  ;;  %v2111_v60 = vsub.f32 %v52_v7, %v2074_v32 }
  0x15   :  { %229 = vmatpush.msra.mxu2 %v1980_v40  ;;  %277 = vmatpush.msra.mxu3 %v1965_v33  ;;  %v163_v62 = vand.u32 4294901760, %v162_v38  ;;  %v174_v63 = vsub.f32 %v2048_v2, %v3100_v39  ;;  %v2121_v21 = vand.u32 4294901760, %v50_v47  ;;  %v180_v6 = vsub.f32 %v2059_v8, %v3103_v42 }
  0x16   :  { %83 = vmatpush.msra.mxu0 %v1968_v34  ;;  %140 = vmatpush.msra.mxu1 %v139_v61  ;;  %3133 = vst [vmem:[#allocation6_spill] sm:$0xff] %v2103_v56  ;;  %v49_v61 = vld [vmem:[%s3095_s1 + $0xd8] sm:$0xff]  ;;  %v3111_v7 = vand.u32 4294901760, %v2091_v43  ;;  %v169_v38 = vand.u32 4294901760, %v168_v49  ;;  %v3112_v39 = vand.u32 4294901760, %v2101_v54  ;;  %v2135_v30 = vsub.f32 %v51_v36, %v2103_v56 }
  0x17   :  { %232 = vmatpush.msra.mxu2 %v1994_v46  ;;  %279 = vmatpush.msra.mxu3 %v1968_v34  ;;  %v2137_v1 = vand.u32 4294901760, %v49_v61  ;;  %v3116_v42 = vand.u32 4294901760, %v2108_v57  ;;  %v3115_v58 = vand.u32 4294901760, %v2111_v60  ;;  %v175_v49 = vand.u32 4294901760, %v174_v63 }
  0x18   :  { %85 = vmatpush.msra.mxu0 %v1990_v44  ;;  %146 = vmatpush.msra.mxu1 %v145_v13  ;;  %v3109_v13 = vand.u32 4294901760, %v2085_v41  ;;  %v2151_v51 = vsub.f32 %v50_v47, %v2121_v21  ;;  %v181_v28 = vand.u32 4294901760, %v180_v6  ;;  %v192_v47 = vsub.f32 %v2101_v54, %v3112_v39  ;;  %v45_v6 = vld [vmem:[%s3095_s1 + $0xb8] sm:$0xff] }
  0x19   :  { %235 = vmatpush.msra.mxu2 %v2009_v52  ;;  %281 = vmatpush.msra.mxu3 %v1990_v44  ;;  %v198_v39 = vsub.f32 %v2108_v57, %v3116_v42  ;;  %v2194_v63 = vand.u32 4294901760, %v45_v6  ;;  %v3134_v42 = vand.u32 4294901760, %v2135_v30  ;;  %vm749_vm0 = vcmask 58368  }
  0x1a   :  { %87 = vmatpush.msra.mxu0 %v2005_v50  ;;  %152 = vmatpush.msra.mxu1 %v151_v37  ;;  %v48_v37 = vld [vmem:[%s3095_s1 + $0xd0] sm:$0xff]  ;;  %v186_v36 = vsub.f32 %v2085_v41, %v3109_v13  ;;  %v2169_v13 = vsub.f32 %v49_v61, %v2137_v1  ;;  %vm771_vm5 = vcmask 64512   ;;  %vm1070_vm6 = vcmask 1041408  }
  0x1b   :  { %238 = vmatpush.msra.mxu2 %v2029_v59  ;;  %283 = vmatpush.msra.mxu3 %v2005_v50  ;;  %v2153_v45 = vand.u32 4294901760, %v48_v37  ;;  %vm1794_vm7 = vcmask 254976  }
  0x1c   :  { %89 = vmatpush.msra.mxu0 %v2013_v53  ;;  %158 = vmatpush.msra.mxu1 %v157_v48  ;;  %v47_v48 = vld [vmem:[%s3095_s1 + $0xc8] sm:$0xff]  ;;  %v187_v61 = vand.u32 4294901760, %v186_v36  ;;  %v193_v36 = vand.u32 4294901760, %v192_v47 }
  0x1d   :  { %241 = vmatpush.msra.mxu2 %v2048_v2  ;;  %285 = vmatpush.msra.mxu3 %v2013_v53  ;;  %v2171_v27 = vand.u32 4294901760, %v47_v48  ;;  %v2189_v23 = vsub.f32 %v48_v37, %v2153_v45  ;;  %v461_v37 = vsub.f32 %v2135_v30, %v3134_v42  ;;  %v43_v47 = vld [vmem:[%s3095_s1 + $0xa8] sm:$0xff]  ;;  %v199_v42 = vand.u32 4294901760, %v198_v39 }
  0x1e   :  { %91 = vmatpush.msra.mxu0 %v2044_v0  ;;  %164 = vmatpush.msra.mxu1 %v163_v62  ;;  %v449_v62 = vsub.f32 %v2091_v43, %v3111_v7  ;;  %v2181_v7 = vand.u32 4294901760, %v46_v35 }
  0x1f   :  { %244 = vmatpush.msra.mxu2 %v2059_v8  ;;  %287 = vmatpush.msra.mxu3 %v2044_v0  ;;  %v462_v39 = vand.u32 4294901760, %v461_v37 }
  0x20   :  { %93 = vmatpush.msra.mxu0 %v2067_v26  ;;  %170 = vmatpush.msra.mxu1 %v169_v38  ;;  %v455_v38 = vsub.f32 %v2111_v60, %v3115_v58  ;;  %v450_v58 = vand.u32 4294901760, %v449_v62  ;;  %v3135_v62 = vand.u32 4294901760, %v1918_v15 }
  0x21   :  { %247 = vmatpush.msra.mxu2 %v2085_v41  ;;  %289 = vmatpush.msra.mxu3 %v2067_v26 }
  0x22   :  { %95 = vmatpush.msra.mxu0 %v2072_v31  ;;  %176 = vmatpush.msra.mxu1 %v175_v49  ;;  %v44_v49 = vld [vmem:[%s3095_s1 + $0xb0] sm:$0xff]  ;;  %v456_v24 = vand.u32 4294901760, %v455_v38  ;;  %v3137_v38 = vand.u32 4294901760, %v1922_v16  ;;  %v2236_v16 = vand.u32 4294901760, %v43_v47 }
  0x23   :  { %250 = vmatpush.msra.mxu2 %v2101_v54  ;;  %291 = vmatpush.msra.mxu3 %v2072_v31 }
  0x24   :  { %302 = vmatpush.msrb.mxu0 %v107_v22  ;;  %182 = vmatpush.msra.mxu1 %v181_v28  ;;  %v2205_v22 = vsub.f32 %v47_v48, %v2171_v27  ;;  %v2211_v28 = vsub.f32 %v46_v35, %v2181_v7  ;;  %v3136_v48 = vand.u32 4294901760, %v2151_v51  ;;  %v2226_v35 = vsub.f32 %v45_v6, %v2194_v63 }
  0x25   :  { %253 = vmatpush.msra.mxu2 %v2108_v57  ;;  %451 = vmatpush.msrb.mxu3 %v450_v58  ;;  %v3139_v58 = vand.u32 4294901760, %v1927_v18 }
  0x26   :  { %306 = vmatpush.msrb.mxu0 %v3135_v62  ;;  %188 = vmatpush.msra.mxu1 %v187_v61  ;;  %v467_v14 = vsub.f32 %v2151_v51, %v3136_v48  ;;  %v2221_v62 = vand.u32 4294901760, %v44_v49  ;;  %v42_v61 = vld [vmem:[%s3095_s1 + $0xa0] sm:$0xff]  ;;  %v3138_v48 = vand.u32 4294901760, %v2169_v13  ;;  %v3142_v6 = vand.u32 4294901760, %v2205_v22 }
  0x27   :  { %406 = vmatpush.msrb.mxu2 %v2061_v12  ;;  %457 = vmatpush.msrb.mxu3 %v456_v24  ;;  %v2251_v18 = vand.u32 4294901760, %v42_v61  ;;  %v3141_v24 = vand.u32 4294901760, %v1930_v19  ;;  %v3143_v19 = vand.u32 4294901760, %v1933_v20 }
  0x28   :  { %310 = vmatpush.msrb.mxu0 %v3137_v38  ;;  %194 = vmatpush.msra.mxu1 %v193_v36  ;;  %v473_v15 = vsub.f32 %v2169_v13, %v3138_v48  ;;  %v41_v36 = vld [vmem:[%s3095_s1 + $0x98] sm:$0xff]  ;;  %v468_v37 = vand.u32 4294901760, %v467_v14  ;;  %v3140_v38 = vand.u32 4294901760, %v2189_v23  ;;  %v2249_v55 = vsub.f32 %v44_v49, %v2221_v62 }
  0x29   :  { %408 = vmatpush.msrb.mxu2 %v2074_v32  ;;  %463 = vmatpush.msrb.mxu3 %v462_v39  ;;  %v2262_v49 = vsub.f32 %v43_v47, %v2236_v16 }
  0x2a   :  { %314 = vmatpush.msrb.mxu0 %v3139_v58  ;;  %200 = vmatpush.msra.mxu1 %v199_v42  ;;  %v479_v48 = vsub.f32 %v2189_v23, %v3140_v38  ;;  %v3120_v58 = vand.u32 4294901760, %v2226_v35  ;;  %v60_v42 = vld.sshfl [vmem:[#allocation1] sm:$0xff pattern:$0x73625140]  ;;  %v474_v14 = vand.u32 4294901760, %v473_v15  ;;  %v485_v38 = vsub.f32 %v2205_v22, %v3142_v6  ;;  %v40_v15 = vld [vmem:[%s3095_s1 + $0x90] sm:$0xff] }
  0x2b   :  { %410 = vmatpush.msrb.mxu2 %v2103_v56  ;;  %v2264_v56 = vand.u32 4294901760, %v41_v36  ;;  %469 = vmatpush.msrb.mxu3 %v468_v37  ;;  %v3121_v39 = vand.u32 4294901760, %v2249_v55  ;;  %v2278_v6 = vsub.f32 %v42_v61, %v2251_v18  ;;  %v2280_v20 = vand.u32 4294901760, %v60_v42  ;;  %v39_v37 = vld [vmem:[%s3095_s1 + $0x88] sm:$0xff] }
  0x2c   :  { %318 = vmatpush.msrb.mxu0 %v3141_v24  ;;  %369 = vmatpush.msrb.mxu1 %v1886_v3  ;;  %v3144_v3 = vand.u32 4294901760, %v2211_v28  ;;  %v480_v47 = vand.u32 4294901760, %v479_v48  ;;  %v486_v61 = vand.u32 4294901760, %v485_v38  ;;  %v508_v48 = vand.u32 4294901760, %v2262_v49 }
  0x2d   :  { %412 = vmatpush.msrb.mxu2 %v2121_v21  ;;  %475 = vmatpush.msrb.mxu3 %v474_v14  ;;  %v503_v14 = vsub.f32 %v2249_v55, %v3121_v39  ;;  %v2310_v38 = vsub.f32 %v60_v42, %v2280_v20 }
  0x2e   :  { %322 = vmatpush.msrb.mxu0 %v3143_v19  ;;  %371 = vmatpush.msrb.mxu1 %v1888_v4  ;;  %v491_v24 = vsub.f32 %v2211_v28, %v3144_v3  ;;  %v3145_v4 = vand.u32 4294901760, %v1952_v29  ;;  %v497_v19 = vsub.f32 %v2226_v35, %v3120_v58  ;;  %v2293_v3 = vand.u32 4294901760, %v40_v15  ;;  %v38_v58 = vld [vmem:[%s3095_s1 + $0x80] sm:$0xff] }
  0x2f   :  { %414 = vmatpush.msrb.mxu2 %v2137_v1  ;;  %v2296_v29 = vsub.f32 %v41_v36, %v2264_v56  ;;  %481 = vmatpush.msrb.mxu3 %v480_v47  ;;  %v514_v36 = vand.u32 4294901760, %v2278_v6  ;;  %v509_v47 = vsub.f32 %v2262_v49, %v508_v48  ;;  %v2325_v39 = vand.u32 4294901760, %v38_v58 }
  0x30   :  { %326 = vmatpush.msrb.mxu0 %v3145_v4  ;;  %373 = vmatpush.msrb.mxu1 %v1890_v5  ;;  %v3146_v5 = vand.u32 4294901760, %v1980_v40  ;;  %v492_v4 = vand.u32 4294901760, %v491_v24  ;;  %v2312_v40 = vand.u32 4294901760, %v39_v37  ;;  %v498_v24 = vand.u32 4294901760, %v497_v19 }
  0x31   :  { %416 = vmatpush.msrb.mxu2 %v2153_v45  ;;  %487 = vmatpush.msrb.mxu3 %v486_v61  ;;  %v2323_v42 = vsub.f32 %v40_v15, %v2293_v3  ;;  %v515_v19 = vsub.f32 %v2278_v6, %v514_v36  ;;  %v98_v61 = vand.u32 4294901760, %v2310_v38 }
  0x32   :  { %330 = vmatpush.msrb.mxu0 %v3146_v5  ;;  %375 = vmatpush.msrb.mxu1 %v1901_v9  ;;  %v3147_v9 = vand.u32 4294901760, %v1994_v46  ;;  %v520_v5 = vand.u32 4294901760, %v2296_v29  ;;  %v3148_v46 = vand.u32 4294901760, %v2009_v52  ;;  %v2336_v15 = vsub.f32 %v39_v37, %v2312_v40 }
  0x33   :  { %418 = vmatpush.msrb.mxu2 %v2171_v27  ;;  %493 = vmatpush.msrb.mxu3 %v492_v4  ;;  %v526_v4 = vand.u32 4294901760, %v2323_v42  ;;  %v3150_v37 = vand.u32 4294901760, %v2048_v2 }
  0x34   :  { %334 = vmatpush.msrb.mxu0 %v3147_v9  ;;  %377 = vmatpush.msrb.mxu1 %v1903_v10  ;;  %v504_v10 = vand.u32 4294901760, %v503_v14  ;;  %v3149_v9 = vand.u32 4294901760, %v2029_v59  ;;  %v521_v52 = vsub.f32 %v2296_v29, %v520_v5  ;;  %v2347_v14 = vsub.f32 %v38_v58, %v2325_v39  ;;  %v61_v59 = vld.sshfl [vmem:[#allocation1 + $0x8] sm:$0xff pattern:$0x73625140] }
  0x35   :  { %420 = vmatpush.msrb.mxu2 %v2181_v7  ;;  %499 = vmatpush.msrb.mxu3 %v498_v24  ;;  %v99_v24 = vsub.f32 %v2310_v38, %v98_v61 }
  0x36   :  { %338 = vmatpush.msrb.mxu0 %v3148_v46  ;;  %379 = vmatpush.msrb.mxu1 %v1905_v11  ;;  %v510_v11 = vand.u32 4294901760, %v509_v47  ;;  %v532_v47 = vand.u32 4294901760, %v2336_v15  ;;  %v3151_v46 = vand.u32 4294901760, %v2059_v8  ;;  %v522_v2 = vand.u32 4294901760, %v521_v52 }
  0x37   :  { %422 = vmatpush.msrb.mxu2 %v2194_v63  ;;  %505 = vmatpush.msrb.mxu3 %v504_v10  ;;  %v538_v58 = vand.u32 4294901760, %v2347_v14  ;;  %v2363_v10 = vand.u32 4294901760, %v61_v59  ;;  %v3154_v52 = vand.u32 4294901760, %v2108_v57  ;;  %v3158_v57 = vand.u32 4294901760, %v2151_v51 }
  0x38   :  { %342 = vmatpush.msrb.mxu0 %v3149_v9  ;;  %381 = vmatpush.msrb.mxu1 %v1924_v17  ;;  %v516_v17 = vand.u32 4294901760, %v515_v19  ;;  %v3152_v19 = vand.u32 4294901760, %v2085_v41  ;;  %v533_v8 = vsub.f32 %v2336_v15, %v532_v47  ;;  %v3153_v9 = vand.u32 4294901760, %v2101_v54 }
  0x39   :  { %424 = vmatpush.msrb.mxu2 %v2221_v62  ;;  %511 = vmatpush.msrb.mxu3 %v510_v11  ;;  %v2380_v11 = vsub.f32 %v61_v59, %v2363_v10 }
  0x3a   :  { %346 = vmatpush.msrb.mxu0 %v3150_v37  ;;  %383 = vmatpush.msrb.mxu1 %v1943_v25  ;;  %v527_v25 = vsub.f32 %v2323_v42, %v526_v4 }
  0x3b   :  { %426 = vmatpush.msrb.mxu2 %v2236_v16  ;;  %517 = vmatpush.msrb.mxu3 %v516_v17  ;;  %v439_v37 = vand.u32 4294901760, %v2380_v11 }
  0x3c   :  { %350 = vmatpush.msrb.mxu0 %v3151_v46  ;;  %385 = vmatpush.msrb.mxu1 %v1965_v33  ;;  %v100_v33 = vand.u32 4294901760, %v99_v24  ;;  %v528_v41 = vand.u32 4294901760, %v527_v25  ;;  %v770_v46 = vld [vmem:[%s3097_s3 + $0x8] sm:$0xff] }
  0x3d   :  { %428 = vmatpush.msrb.mxu2 %v2251_v18  ;;  %523 = vmatpush.msrb.mxu3 %v522_v2  ;;  %v936_v2 = vand.u32 4294901760, %v770_v46 }
  0x3e   :  { %354 = vmatpush.msrb.mxu0 %v3152_v19  ;;  %387 = vmatpush.msrb.mxu1 %v1968_v34  ;;  %v539_v34 = vsub.f32 %v2347_v14, %v538_v58 }
  0x3f   :  { %430 = vmatpush.msrb.mxu2 %v2264_v56  ;;  %101 = vmatmul.f32.vlgmr.msra.gmra.mxu0 %v100_v33  ;;  %v2494_v25 = vsub.f32 %v770_v46, %v936_v2 }
  0x40   :  { %358 = vmatpush.msrb.mxu0 %v3153_v9  ;;  %389 = vmatpush.msrb.mxu1 %v1990_v44  ;;  %v534_v44 = vand.u32 4294901760, %v533_v8  ;;  %v540_v54 = vand.u32 4294901760, %v539_v34 }
  0x41   :  { %432 = vmatpush.msrb.mxu2 %v2293_v3  ;;  %529 = vmatpush.msrb.mxu3 %v528_v41 }
  0x42   :  { %362 = vmatpush.msrb.mxu0 %v3154_v52  ;;  %391 = vmatpush.msrb.mxu1 %v2005_v50  ;;  %v3155_v50 = vand.u32 4294901760, %v2091_v43 }
  0x43   :  { %434 = vmatpush.msrb.mxu2 %v2312_v40  ;;  %535 = vmatpush.msrb.mxu3 %v534_v44 }
  0x44   :  { %549 = vmatpush.msra.mxu0 %v2091_v43  ;;  %393 = vmatpush.msrb.mxu1 %v2013_v53  ;;  %v440_v53 = vsub.f32 %v2380_v11, %v439_v37 }
  0x45   :  { %436 = vmatpush.msrb.mxu2 %v2325_v39  ;;  %541 = vmatpush.msrb.mxu3 %v540_v54 }
  0x46   :  { %552 = vmatpush.msra.mxu0 %v2111_v60  ;;  %395 = vmatpush.msrb.mxu1 %v2044_v0  ;;  %v3156_v0 = vand.u32 4294901760, %v2111_v60  ;;  %v441_v43 = vand.u32 4294901760, %v440_v53  ;;  %v1089_v53 = vld [vmem:[%s3098_s4 + $0x78] sm:$0xff] }
  0x47   :  { %256 = vmatmul.f32.vlgmr.msra.gmra.mxu2 %v2310_v38  ;;  %295 = vmatmul.f32.vlgmr.msra.gmra.mxu3 %v98_v61 }
  0x48   :  { %555 = vmatpush.msra.mxu0 %v2135_v30  ;;  %643 = vmatpush.msra.mxu2 %v3155_v50 }
  0x49   :  { %397 = vmatpush.msrb.mxu1 %v2067_v26  ;;  %710 = vmatpush.msra.mxu3 %v2061_v12  ;;  %v3157_v26 = vand.u32 4294901760, %v2135_v30  ;;  %v3160_v30 = vand.u32 4294901760, %v2169_v13 }
  0x4a   :  { %558 = vmatpush.msra.mxu0 %v2151_v51  ;;  %647 = vmatpush.msra.mxu2 %v3156_v0  ;;  %v3161_v51 = vand.u32 4294901760, %v2189_v23  ;;  %v1088_v0 = vld [vmem:[%s3098_s4 + $0x70] sm:$0xff] }
  0x4b   :  { %399 = vmatpush.msrb.mxu1 %v2072_v31  ;;  %712 = vmatpush.msra.mxu3 %v2074_v32  ;;  %v3159_v31 = vld [vmem:[#allocation6_spill] sm:$0xff] }
  0x4c   :  { %561 = vmatpush.msra.mxu0 %v2169_v13  ;;  %202 = vmatmul.f32.vlgmr.msra.gmra.mxu1 %v2280_v20 }
  0x4d   :  { %651 = vmatpush.msra.mxu2 %v3157_v26  ;;  %602 = vmatpush.msra.mxu1 %v2061_v12  ;;  %v3162_v12 = vand.u32 4294901760, %v2205_v22  ;;  %v1087_v26 = vld [vmem:[%s3098_s4 + $0x68] sm:$0xff] }
  0x4e   :  { %564 = vmatpush.msra.mxu0 %v2189_v23  ;;  %714 = vmatpush.msra.mxu3 %v3159_v31  ;;  %v3163_v23 = vand.u32 4294901760, %v2211_v28 }
  0x4f   :  { %655 = vmatpush.msra.mxu2 %v3158_v57  ;;  %604 = vmatpush.msra.mxu1 %v2074_v32  ;;  %v2507_v57 = vand.u32 4294901760, %v1089_v53 }
  0x50   :  { %442 = vmatmul.f32.vlgmr.msrb.gmra.mxu2 %v441_v43  ;;  %567 = vmatpush.msra.mxu0 %v2205_v22 }
  0x51   :  { %606 = vmatpush.msra.mxu1 %v3159_v31  ;;  %659 = vmatpush.msra.mxu2 %v3160_v30  ;;  %v2509_v31 = vand.u32 4294901760, %v1088_v0  ;;  %v2511_v30 = vand.u32 4294901760, %v1087_v26 }
  0x52   :  { %716 = vmatpush.msra.mxu3 %v2121_v21  ;;  %364 = vmatmul.f32.vlgmr.msrb.gmra.mxu0 %v2280_v20 }
  0x53   :  { %543 = vmatmul.f32.vlgmr.msrb.gmra.mxu3 %v2363_v10  ;;  %570 = vmatpush.msra.mxu0 %v2211_v28 }
  0x54   :  { %608 = vmatpush.msra.mxu1 %v2121_v21  ;;  %663 = vmatpush.msra.mxu2 %v3161_v51  ;;  %v1086_v51 = vld [vmem:[%s3098_s4 + $0x60] sm:$0xff] }
  0x55   :  { %718 = vmatpush.msra.mxu3 %v2137_v1  ;;  %401 = vmatmul.f32.vlgmr.msrb.gmra.mxu1 %v2280_v20 }
  0x56   :  { %573 = vmatpush.msra.mxu0 %v2226_v35  ;;  %610 = vmatpush.msra.mxu1 %v2137_v1  ;;  %v3164_v1 = vand.u32 4294901760, %v2226_v35 }
  0x57   :  { %667 = vmatpush.msra.mxu2 %v3162_v12  ;;  %720 = vmatpush.msra.mxu3 %v2153_v45 }
  0x58   :  { %576 = vmatpush.msra.mxu0 %v2249_v55  ;;  %612 = vmatpush.msra.mxu1 %v2153_v45  ;;  %v3165_v45 = vand.u32 4294901760, %v2249_v55 }
  0x59   :  { %671 = vmatpush.msra.mxu2 %v3163_v23  ;;  %722 = vmatpush.msra.mxu3 %v2171_v27  ;;  %v2517_v23 = vsub.f32 %v1089_v53, %v2507_v57 }
  0x5a   :  { %579 = vmatpush.msra.mxu0 %v2262_v49  ;;  %614 = vmatpush.msra.mxu1 %v2171_v27  ;;  %v1813_v27 = vld [vmem:[%s3096_s2] ss:$0 sm:$0xff] }
  0x5b   :  { %675 = vmatpush.msra.mxu2 %v3164_v1  ;;  %724 = vmatpush.msra.mxu3 %v2181_v7  ;;  %v2520_v1 = vsub.f32 %v1088_v0, %v2509_v31 }
  0x5c   :  { %582 = vmatpush.msra.mxu0 %v2278_v6  ;;  %616 = vmatpush.msra.mxu1 %v2181_v7 }
  0x5d   :  { %679 = vmatpush.msra.mxu2 %v3165_v45  ;;  %726 = vmatpush.msra.mxu3 %v2194_v63  ;;  %v2522_v45 = vand.u32 4294901760, %v1086_v51 }
  0x5e   :  { %585 = vmatpush.msra.mxu0 %v2296_v29  ;;  %618 = vmatpush.msra.mxu1 %v2194_v63 }
  0x5f   :  { %683 = vmatpush.msra.mxu2 %v508_v48  ;;  %728 = vmatpush.msra.mxu3 %v2221_v62 }
  0x60   :  { %588 = vmatpush.msra.mxu0 %v2323_v42  ;;  %620 = vmatpush.msra.mxu1 %v2221_v62 }
  0x61   :  { %687 = vmatpush.msra.mxu2 %v514_v36  ;;  %730 = vmatpush.msra.mxu3 %v2236_v16 }
  0x62   :  { %591 = vmatpush.msra.mxu0 %v2336_v15  ;;  %622 = vmatpush.msra.mxu1 %v2236_v16 }
  0x63   :  { %691 = vmatpush.msra.mxu2 %v520_v5  ;;  %732 = vmatpush.msra.mxu3 %v2251_v18 }
  0x64   :  { %594 = vmatpush.msra.mxu0 %v2347_v14  ;;  %624 = vmatpush.msra.mxu1 %v2251_v18 }
  0x65   :  { %695 = vmatpush.msra.mxu2 %v526_v4  ;;  %734 = vmatpush.msra.mxu3 %v2264_v56  ;;  %v769_v4 = vld [vmem:[%s3097_s3] sm:$0xff] }
  0x66   :  { %597 = vmatmul.f32.vlgmr.msra.gmra.mxu0 %v2380_v11  ;;  %626 = vmatpush.msra.mxu1 %v2264_v56  ;;  %v790_v14 = vand.u32 4294901760, %v769_v4 }
  0x67   :  { %699 = vmatpush.msra.mxu2 %v532_v47  ;;  %736 = vmatpush.msra.mxu3 %v2293_v3 }
  0x68   :  { %628 = vmatpush.msra.mxu1 %v2293_v3  ;;  %v817_v59 = vsub.f32 %v769_v4, %v790_v14  ;;  %791 = vmatpush.msrb.mxu0 %v790_v14 }
  0x69   :  { %703 = vmatpush.msra.mxu2 %v538_v58  ;;  %738 = vmatpush.msra.mxu3 %v2312_v40  ;;  %v964_v58 = vand.u32 4294901760, %v2494_v25 }
  0x6a   :  { %705 = vmatmul.f32.vlgmr.msra.gmra.mxu2 %v2363_v10  ;;  %630 = vmatpush.msra.mxu1 %v2312_v40  ;;  %v818_v17 = vand.u32 4294901760, %v817_v59 }
  0x6b   :  { %740 = vmatpush.msra.mxu3 %v2325_v39  ;;  %844 = vmatpush.msrb.mxu2 %v817_v59  ;;  %v965_v19 = vsub.f32 %v2494_v25, %v964_v58 }
  0x6c   :  { %742 = vmatmul.f32.vlgmr.msra.gmra.mxu3 %v2363_v10  ;;  %632 = vmatpush.msra.mxu1 %v2325_v39  ;;  %v819_v24 = vsub.f32 %v817_v59, %v818_v17 }
  0x6d   :  { %636 = vmatmul.f32.vlgmr.msra.gmra.mxu1 %v439_v37  ;;  %867 = vmatpush.msrb.mxu3 %v790_v14  ;;  %v966_v33 = vand.u32 4294901760, %v965_v19  ;;  %v1081_v19 = vld [vmem:[%s3098_s4 + $0x38] sm:$0xff] }
  0x6e   :  { %893 = vmatpush.msra.mxu0 %v818_v17  ;;  %v820_v47 = vand.u32 4294901760, %v819_v24  ;;  %937 = vmatpush.msra.mxu2 %v936_v2 }
  0x6f   :  { %967 = vmatpush.msra.mxu3 %v966_v33 }
  0x70   :  { %821 = vmatpush.msrb.mxu1 %v820_v47 }
  0x72   :  { %915 = vmatpush.msra.mxu1 %v790_v14 }
  0xbc   :  { %v102_v55 = vpop.f32.mrf.mxu0 }
  0xbd   :  { %v103_v32 = vadd.f32 %v1813_v27, %v102_v55  ;;  %v1085_v27 = vld [vmem:[%s3098_s4 + $0x58] sm:$0xff] }
  0xc9   :  { %v203_v56 = vpop.f32.mrf.mxu1 }
  0xca   :  { %v204_v60 = vadd.f32 %v203_v56, %v103_v32  ;;  %v257_v13 = vpop.f32.mrf.mxu2  ;;  %v296_v7 = vpop.f32.mrf.mxu3  ;;  %v1155_v32 = vand.u32 4294901760, %v2517_v23  ;;  %v2529_v56 = vsub.f32 %v1087_v26, %v2511_v30 }
  0xcc   :  { %v258_v21 = vadd.f32 %v257_v13, %v204_v60  ;;  %v2531_v13 = vand.u32 4294901760, %v1085_v27 }
  0xce   :  { %v297_v63 = vadd.f32 %v296_v7, %v258_v21  ;;  %v1084_v21 = vld [vmem:[%s3098_s4 + $0x50] sm:$0xff]  ;;  %v1161_v7 = vand.u32 4294901760, %v2520_v1 }
  0xcf   :  { %v365_v22 = vpop.f32.mrf.mxu0 }
  0xd0   :  { %v366_v28 = vadd.f32 %v365_v22, %v297_v63  ;;  %v2538_v63 = vsub.f32 %v1086_v51, %v2522_v45  ;;  %v1078_v51 = vld [vmem:[%s3098_s4 + $0x20] sm:$0xff] }
  0xd2   :  { %v402_v62 = vpop.f32.mrf.mxu1 }
  0xd3   :  { %v403_v35 = vadd.f32 %v402_v62, %v366_v28  ;;  %v443_v16 = vpop.f32.mrf.mxu2  ;;  %v1083_v28 = vld [vmem:[%s3098_s4 + $0x48] sm:$0xff]  ;;  %v1156_v62 = vsub.f32 %v2517_v23, %v1155_v32 }
  0xd5   :  { %v444_v18 = vadd.f32 %v443_v16, %v403_v35  ;;  %v1167_v35 = vand.u32 4294901760, %v2529_v56  ;;  %v2547_v16 = vand.u32 4294901760, %v1084_v21 }
  0xd6   :  { %v544_v49 = vpop.f32.mrf.mxu3 }
  0xd7   :  { %v545_v6 = vadd.f32 %v544_v49, %v444_v18  ;;  %v2550_v49 = vsub.f32 %v1085_v27, %v2531_v13 }
  0xe3   :  { %v598_v39 = vpop.f32.mrf.mxu0 }
  0xe4   :  { %v599_v20 = vadd.f32 %v598_v39, %v545_v6  ;;  %v1162_v39 = vsub.f32 %v2520_v1, %v1161_v7  ;;  %v1173_v6 = vand.u32 4294901760, %v2538_v63 }
  0xea   :  { %v637_v48 = vpop.f32.mrf.mxu1 }
  0xeb   :  { %v638_v3 = vadd.f32 %v637_v48, %v599_v20  ;;  %v2556_v20 = vand.u32 4294901760, %v1083_v28 }
  0xed   :  { %v706_v29 = vpop.f32.mrf.mxu2 }
  0xee   :  { %v707_v36 = vadd.f32 %v706_v29, %v638_v3  ;;  %v1157_v3 = vand.u32 4294901760, %v1156_v62  ;;  %v1168_v29 = vsub.f32 %v2529_v56, %v1167_v35 }
  0xef   :  { %v743_v38 = vpop.f32.mrf.mxu3 }
  0xf0   :  { %v744_v40 = vadd.f32 %v743_v38, %v707_v36  ;;  %v2562_v36 = vsub.f32 %v1084_v21, %v2547_v16  ;;  %v1077_v21 = vld [vmem:[%s3098_s4 + $0x18] sm:$0xff] }
  0xf2   :  { %1814 = vtanh.f32 %v744_v40  ;;  %v1179_v40 = vand.u32 4294901760, %v2550_v49  ;;  %v1185_v4 = vand.u32 4294901760, %v2562_v36 }
  0xf4   :  { %v1180_v14 = vsub.f32 %v2550_v49, %v1179_v40  ;;  %v1186_v24 = vsub.f32 %v2562_v36, %v1185_v4 }
  0xf6   :  { %v1181_v47 = vand.u32 4294901760, %v1180_v14 }
  0xf8   :  { %v1815_v5 = vpop.eup %1814 }
  0xf9   :  { %v747_v42 = vmul.f32 1.442695, %v1815_v5  ;;  %v1163_v5 = vand.u32 4294901760, %v1162_v39  ;;  %v1076_v39 = vld [vmem:[%s3098_s4 + $0x10] sm:$0xff] }
  0xfb   :  { %1816 = vpow2.f32 %v747_v42  ;;  %v1174_v42 = vsub.f32 %v2538_v63, %v1173_v6 }
  0xfd   :  { %v1175_v59 = vand.u32 4294901760, %v1174_v42 }
 0x101   :  { %v1817_v61 = vpop.eup %1816 }
 0x102   :  { %v750_v15 = vsel %vm749_vm0, %v1817_v61, 0.0 }
 0x103   :  { %751 = vadd.xlane.f32.xlu0 %v750_v15  ;;  %v1169_v15 = vand.u32 4294901760, %v1168_v29  ;;  %v2687_v29 = vand.u32 4294901760, %v1076_v39 }
 0x105   :  { %v2699_v14 = vsub.f32 %v1076_v39, %v2687_v29  ;;  %v1103_v39 = vld [vmem:[%s3098_s4 + $0xe8] sm:$0xff] }
 0x176   :  { %v752_v10 = vpop.xlane.xlu0 %751 }
 0x177   :  { %1818 = vrcp.f32 %v752_v10  ;;  %v764_v34 = vand.u32 2147483648, %v752_v10  ;;  %v762_v52 = vand.u32 2147483647, %v752_v10  ;;  %vm758_vm2 = vweird.f32 %v752_v10 }
 0x179   :  { %v765_v54 = vor.u32 1.1754944e-38, %v764_v34  ;;  %vm763_vm4 = vcmp.eq.f32.partialorder %v762_v52, 8.507059e+37  ;;  %v1079_v52 = vld [vmem:[%s3098_s4 + $0x28] sm:$0xff] }
 0x17d   :  { %v1819_v8 = vpop.eup %1818 }
 0x17e   :  { %v754_v9 = vmul.f32 %v1819_v8, %v752_v10  ;;  %vm759_vm1 = vweird.f32 %v1819_v8 }
 0x17f   :  { %vm760_vm3 = vmor %vm758_vm2, %vm759_vm1 }
 0x180   :  { %v755_v41 = vsub.f32 1.0, %v754_v9  ;;  %v1080_v9 = vld [vmem:[%s3098_s4 + $0x30] sm:$0xff] }
 0x182   :  { %v756_v11 = vmul.f32 %v1819_v8, %v755_v41 }
 0x184   :  { %v757_v44 = vadd.f32 %v1819_v8, %v756_v11  ;;  %v2627_v11 = vand.u32 4294901760, %v1080_v9 }
 0x186   :  { %v761_v37 = vsel %vm760_vm3, %v1819_v8, %v757_v44  ;;  %v2615_v8 = vand.u32 4294901760, %v1081_v19 }
 0x187   :  { %v766_v50 = vsel %vm763_vm4, %v765_v54, %v761_v37  ;;  %v2639_v37 = vsub.f32 %v1080_v9, %v2627_v11 }
 0x188   :  { %v767_v43 = vmul.f32 %v1817_v61, %v766_v50  ;;  %v2569_v61 = vsub.f32 %v1083_v28, %v2556_v20  ;;  %v2624_v34 = vsub.f32 %v1081_v19, %v2615_v8  ;;  %v2642_v50 = vand.u32 4294901760, %v1079_v52 }
 0x189   :  { %v1209_v26 = vand.u32 4294901760, %v2639_v37  ;;  %v2672_v28 = vand.u32 4294901760, %v1077_v21 }
 0x18a   :  { %v768_v12 = vadd.f32 1e-10, %v767_v43  ;;  %v1191_v17 = vand.u32 4294901760, %v2569_v61  ;;  %v1203_v54 = vand.u32 4294901760, %v2624_v34  ;;  %v2651_v43 = vsub.f32 %v1079_v52, %v2642_v50 }
 0x18c   :  { %v773_v55 = vsel %vm771_vm5, %v768_v12, 0  ;;  %v1192_v46 = vsub.f32 %v2569_v61, %v1191_v17  ;;  %v1204_v0 = vsub.f32 %v2624_v34, %v1203_v54  ;;  %v2658_v12 = vand.u32 4294901760, %v1078_v51 }
 0x18d   :  { %v792_v60 = vand.u32 4294901760, %v773_v55 }
 0x18e   :  { %v1205_v27 = vand.u32 4294901760, %v1204_v0 }
 0x18f   :  { %823 = vmatmul.f32.vlgmr.msrb.gmra.mxu1 %v792_v60  ;;  %v793_v22 = vsub.f32 %v773_v55, %v792_v60  ;;  %v1210_v55 = vsub.f32 %v2639_v37, %v1209_v26 }
 0x190   :  { %1013 = vmatpush.msrb.mxu1 %v936_v2 }
 0x191   :  { %847 = vmatmul.f32.vlgmr.msrb.gmra.mxu2 %v793_v22  ;;  %v794_v18 = vand.u32 4294901760, %v793_v22  ;;  %v1211_v62 = vand.u32 4294901760, %v1210_v55 }
 0x192   :  { %1039 = vmatpush.msrb.mxu2 %v964_v58  ;;  %v1082_v58 = vld [vmem:[%s3098_s4 + $0x40] sm:$0xff] }
 0x193   :  { %871 = vmatmul.f32.vlgmr.msrb.gmra.mxu3 %v794_v18  ;;  %v795_v48 = vsub.f32 %v793_v22, %v794_v18  ;;  %v2607_v10 = vand.u32 4294901760, %v1082_v58 }
 0x194   :  { %1061 = vmatpush.msrb.mxu3 %v936_v2  ;;  %v1187_v2 = vand.u32 4294901760, %v1186_v24  ;;  %v1074_v24 = vld [vmem:[%s3098_s4] sm:$0xff] }
 0x195   :  { %v796_v38 = vand.u32 4294901760, %v795_v48  ;;  %v2613_v33 = vsub.f32 %v1082_v58, %v2607_v10  ;;  %v2718_v58 = vand.u32 4294901760, %v1074_v24 }
 0x197   :  { %797 = vmatmul.f32.vlgmr.msrb.gmra.mxu0 %v796_v38  ;;  %917 = vmatmul.f32.vlgmr.msra.gmra.mxu1 %v792_v60  ;;  %v1197_v41 = vand.u32 4294901760, %v2613_v33 }
 0x198   :  { %990 = vmatpush.msrb.mxu0 %v2494_v25  ;;  %1158 = vmatpush.msra.mxu1 %v1157_v3  ;;  %v1193_v25 = vand.u32 4294901760, %v1192_v46  ;;  %v2684_v3 = vsub.f32 %v1077_v21, %v2672_v28 }
 0x199   :  { %943 = vmatmul.f32.vlgmr.msra.gmra.mxu2 %v796_v38  ;;  %v1198_v44 = vsub.f32 %v2613_v33, %v1197_v41 }
 0x19a   :  { %1164 = vmatpush.msra.mxu1 %v1163_v5  ;;  %1256 = vmatpush.msra.mxu2 %v2517_v23  ;;  %v1075_v5 = vld [vmem:[%s3098_s4 + $0x8] sm:$0xff] }
 0x19b   :  { %969 = vmatmul.f32.vlgmr.msra.gmra.mxu3 %v792_v60  ;;  %v1199_v53 = vand.u32 4294901760, %v1198_v44  ;;  %v2727_v44 = vsub.f32 %v1074_v24, %v2718_v58 }
 0x19c   :  { %1170 = vmatpush.msra.mxu1 %v1169_v15  ;;  %1259 = vmatpush.msra.mxu2 %v2520_v1  ;;  %v1227_v15 = vand.u32 4294901760, %v2684_v3 }
 0x19d   :  { %1309 = vmatpush.msra.mxu3 %v2507_v57 }
 0x19e   :  { %1176 = vmatpush.msra.mxu1 %v1175_v59  ;;  %1262 = vmatpush.msra.mxu2 %v2529_v56  ;;  %v2702_v59 = vand.u32 4294901760, %v1075_v5  ;;  %v1228_v46 = vsub.f32 %v2684_v3, %v1227_v15 }
 0x19f   :  { %895 = vmatmul.f32.vlgmr.msra.gmra.mxu0 %v792_v60  ;;  %1017 = vmatmul.f32.vlgmr.msrb.gmra.mxu1 %v794_v18 }
 0x1a0   :  { %1311 = vmatpush.msra.mxu3 %v2509_v31  ;;  %1113 = vmatpush.msra.mxu0 %v2507_v57  ;;  %v1229_v19 = vand.u32 4294901760, %v1228_v46 }
 0x1a1   :  { %1041 = vmatmul.f32.vlgmr.msrb.gmra.mxu2 %v792_v60  ;;  %1182 = vmatpush.msra.mxu1 %v1181_v47 }
 0x1a2   :  { %1265 = vmatpush.msra.mxu2 %v2538_v63  ;;  %1313 = vmatpush.msra.mxu3 %v2511_v30  ;;  %v1101_v63 = vld [vmem:[%s3098_s4 + $0xd8] sm:$0xff] }
 0x1a3   :  { %1063 = vmatmul.f32.vlgmr.msrb.gmra.mxu3 %v792_v60  ;;  %1115 = vmatpush.msra.mxu0 %v2509_v31  ;;  %v1215_v60 = vand.u32 4294901760, %v2651_v43 }
 0x1a4   :  { %1188 = vmatpush.msra.mxu1 %v1187_v2  ;;  %1268 = vmatpush.msra.mxu2 %v2550_v49  ;;  %v1233_v2 = vand.u32 4294901760, %v2699_v14  ;;  %v1100_v49 = vld [vmem:[%s3098_s4 + $0xd0] sm:$0xff] }
 0x1a5   :  { %1315 = vmatpush.msra.mxu3 %v2522_v45  ;;  %1117 = vmatpush.msra.mxu0 %v2511_v30  ;;  %v1216_v18 = vsub.f32 %v2651_v43, %v1215_v60 }
 0x1a6   :  { %1194 = vmatpush.msra.mxu1 %v1193_v25  ;;  %1271 = vmatpush.msra.mxu2 %v2562_v36  ;;  %v2714_v25 = vsub.f32 %v1075_v5, %v2702_v59  ;;  %v1234_v9 = vsub.f32 %v2699_v14, %v1233_v2  ;;  %v1099_v36 = vld [vmem:[%s3098_s4 + $0xc8] sm:$0xff] }
 0x1a7   :  { %993 = vmatmul.f32.vlgmr.msrb.gmra.mxu0 %v793_v22  ;;  %1317 = vmatpush.msra.mxu3 %v2531_v13  ;;  %v2670_v22 = vsub.f32 %v1078_v51, %v2658_v12  ;;  %v1217_v38 = vand.u32 4294901760, %v1216_v18  ;;  %v1105_v51 = vld [vmem:[%s3098_s4 + $0xf8] sm:$0xff] }
 0x1a8   :  { %1119 = vmatpush.msra.mxu0 %v2522_v45  ;;  %1274 = vmatpush.msra.mxu2 %v2569_v61  ;;  %v1239_v52 = vand.u32 4294901760, %v2714_v25  ;;  %v2741_v55 = vand.u32 4294901760, %v1105_v51  ;;  %v1098_v61 = vld [vmem:[%s3098_s4 + $0xc0] sm:$0xff] }
 0x1a9   :  { %1319 = vmatpush.msra.mxu3 %v2547_v16  ;;  %1200 = vmatpush.msra.mxu1 %v1199_v53  ;;  %v1221_v48 = vand.u32 4294901760, %v2670_v22  ;;  %v1235_v53 = vand.u32 4294901760, %v1234_v9  ;;  %v2795_v9 = vand.u32 4294901760, %v1101_v63 }
 0x1aa   :  { %1121 = vmatpush.msra.mxu0 %v2531_v13  ;;  %1277 = vmatpush.msra.mxu2 %v2613_v33  ;;  %v1240_v0 = vsub.f32 %v2714_v25, %v1239_v52  ;;  %v1097_v33 = vld [vmem:[%s3098_s4 + $0xb8] sm:$0xff] }
 0x1ab   :  { %1321 = vmatpush.msra.mxu3 %v2556_v20  ;;  %1206 = vmatpush.msra.mxu1 %v1205_v27  ;;  %v1222_v42 = vsub.f32 %v2670_v22, %v1221_v48  ;;  %v1245_v27 = vand.u32 4294901760, %v2727_v44 }
 0x1ac   :  { %1123 = vmatpush.msra.mxu0 %v2547_v16  ;;  %1280 = vmatpush.msra.mxu2 %v2624_v34  ;;  %v1241_v21 = vand.u32 4294901760, %v1240_v0  ;;  %v2810_v0 = vand.u32 4294901760, %v1100_v49  ;;  %v1096_v34 = vld [vmem:[%s3098_s4 + $0xb0] sm:$0xff] }
 0x1ad   :  { %1323 = vmatpush.msra.mxu3 %v2607_v10  ;;  %1212 = vmatpush.msra.mxu1 %v1211_v62  ;;  %v1223_v47 = vand.u32 4294901760, %v1222_v42  ;;  %v1104_v62 = vld [vmem:[%s3098_s4 + $0xf0] sm:$0xff]  ;;  %v1246_v23 = vsub.f32 %v2727_v44, %v1245_v27  ;;  %v1102_v42 = vld [vmem:[%s3098_s4 + $0xe0] sm:$0xff] }
 0x1ae   :  { %1125 = vmatpush.msra.mxu0 %v2556_v20  ;;  %1283 = vmatpush.msra.mxu2 %v2639_v37  ;;  %v2755_v18 = vand.u32 4294901760, %v1104_v62  ;;  %v2779_v24 = vand.u32 4294901760, %v1102_v42  ;;  %v1094_v37 = vld [vmem:[%s3098_s4 + $0xa0] sm:$0xff] }
 0x1af   :  { %1325 = vmatpush.msra.mxu3 %v2615_v8  ;;  %1218 = vmatpush.msra.mxu1 %v1217_v38  ;;  %v1247_v1 = vand.u32 4294901760, %v1246_v23  ;;  %v2764_v38 = vand.u32 4294901760, %v1103_v39  ;;  %v2827_v23 = vsub.f32 %v1100_v49, %v2810_v0  ;;  %v2872_v49 = vand.u32 4294901760, %v1096_v34 }
 0x1b0   :  { %1127 = vmatpush.msra.mxu0 %v2607_v10  ;;  %1286 = vmatpush.msra.mxu2 %v2651_v43  ;;  %v2767_v5 = vsub.f32 %v1104_v62, %v2755_v18  ;;  %v2824_v62 = vand.u32 4294901760, %v1099_v36 }
 0x1b1   :  { %1327 = vmatpush.msra.mxu3 %v2627_v11  ;;  %1224 = vmatpush.msra.mxu1 %v1223_v47  ;;  %v2782_v47 = vsub.f32 %v1103_v39, %v2764_v38  ;;  %v2843_v39 = vand.u32 4294901760, %v1098_v61 }
 0x1b2   :  { %1129 = vmatpush.msra.mxu0 %v2615_v8  ;;  %1289 = vmatpush.msra.mxu2 %v2670_v22  ;;  %v1092_v22 = vld [vmem:[%s3098_s4 + $0x90] sm:$0xff] }
 0x1b3   :  { %1329 = vmatpush.msra.mxu3 %v2642_v50  ;;  %1230 = vmatpush.msra.mxu1 %v1229_v19  ;;  %v1508_v19 = vand.u32 4294901760, %v2782_v47 }
 0x1b4   :  { %1131 = vmatpush.msra.mxu0 %v2627_v11  ;;  %1292 = vmatpush.msra.mxu2 %v2684_v3  ;;  %v2936_v3 = vand.u32 4294901760, %v1092_v22 }
 0x1b5   :  { %1331 = vmatpush.msra.mxu3 %v2658_v12  ;;  %1236 = vmatpush.msra.mxu1 %v1235_v53  ;;  %v1509_v53 = vsub.f32 %v2782_v47, %v1508_v19 }
 0x1b6   :  { %1133 = vmatpush.msra.mxu0 %v2642_v50  ;;  %1295 = vmatpush.msra.mxu2 %v2699_v14  ;;  %v1090_v14 = vld [vmem:[%s3098_s4 + $0x80] sm:$0xff] }
 0x1b7   :  { %1333 = vmatpush.msra.mxu3 %v2672_v28  ;;  %1242 = vmatpush.msra.mxu1 %v1241_v21 }
 0x1b8   :  { %1135 = vmatpush.msra.mxu0 %v2658_v12  ;;  %1298 = vmatpush.msra.mxu2 %v2714_v25 }
 0x1b9   :  { %1335 = vmatpush.msra.mxu3 %v2687_v29  ;;  %1248 = vmatpush.msra.mxu1 %v1247_v1  ;;  %v2846_v1 = vsub.f32 %v1099_v36, %v2824_v62 }
 0x1ba   :  { %1137 = vmatpush.msra.mxu0 %v2672_v28  ;;  %1301 = vmatpush.msra.mxu2 %v2727_v44 }
 0x1bb   :  { %1337 = vmatpush.msra.mxu3 %v2702_v59  ;;  %1417 = vmatpush.msrb.mxu1 %v2507_v57  ;;  %v2799_v57 = vsub.f32 %v1102_v42, %v2779_v24 }
 0x1bc   :  { %1139 = vmatpush.msra.mxu0 %v2687_v29  ;;  %1454 = vmatpush.msrb.mxu2 %v2741_v55 }
 0x1bd   :  { %1339 = vmatpush.msra.mxu3 %v2718_v58  ;;  %1419 = vmatpush.msrb.mxu1 %v2509_v31  ;;  %v2813_v31 = vsub.f32 %v1101_v63, %v2795_v9  ;;  %v3131_v63 = vand.u32 4294901760, %v2846_v1 }
 0x1be   :  { %1141 = vmatpush.msra.mxu0 %v2702_v59  ;;  %1456 = vmatpush.msrb.mxu2 %v2755_v18 }
 0x1bf   :  { %1421 = vmatpush.msrb.mxu1 %v2511_v30  ;;  %v1520_v21 = vand.u32 4294901760, %v2813_v31 }
 0x1c0   :  { %1143 = vmatpush.msra.mxu0 %v2718_v58  ;;  %1458 = vmatpush.msrb.mxu2 %v2764_v38 }
 0x1c1   :  { %1423 = vmatpush.msrb.mxu1 %v2522_v45  ;;  %v1526_v45 = vand.u32 4294901760, %v2827_v23 }
 0x1c2   :  { %1350 = vmatpush.msrb.mxu0 %v1155_v32  ;;  %v2753_v32 = vsub.f32 %v1105_v51, %v2741_v55  ;;  %1460 = vmatpush.msrb.mxu2 %v2779_v24  ;;  %v1514_v51 = vand.u32 4294901760, %v2799_v57 }
 0x1c3   :  { %1425 = vmatpush.msrb.mxu1 %v2531_v13  ;;  %v2863_v13 = vsub.f32 %v1098_v61, %v2843_v39  ;;  %v2889_v61 = vsub.f32 %v1096_v34, %v2872_v49 }
 0x1c4   :  { %1354 = vmatpush.msrb.mxu0 %v1161_v7  ;;  %v1496_v7 = vand.u32 4294901760, %v2753_v32  ;;  %1462 = vmatpush.msrb.mxu2 %v2795_v9  ;;  %v1515_v30 = vsub.f32 %v2799_v57, %v1514_v51 }
 0x1c5   :  { %1427 = vmatpush.msrb.mxu1 %v2547_v16  ;;  %v3129_v16 = vand.u32 4294901760, %v2863_v13  ;;  %v3127_v43 = vand.u32 4294901760, %v2889_v61 }
 0x1c6   :  { %1358 = vmatpush.msrb.mxu0 %v1167_v35  ;;  %v1497_v56 = vsub.f32 %v2753_v32, %v1496_v7  ;;  %v1502_v35 = vand.u32 4294901760, %v2767_v5  ;;  %1464 = vmatpush.msrb.mxu2 %v2810_v0  ;;  %v1516_v42 = vand.u32 4294901760, %v1515_v30 }
 0x1c7   :  { %1429 = vmatpush.msrb.mxu1 %v2556_v20  ;;  %v1539_v20 = vsub.f32 %v2863_v13, %v3129_v16 }
 0x1c8   :  { %1362 = vmatpush.msrb.mxu0 %v1173_v6  ;;  %v1498_v6 = vand.u32 4294901760, %v1497_v56  ;;  %v1503_v46 = vsub.f32 %v2767_v5, %v1502_v35  ;;  %1466 = vmatpush.msrb.mxu2 %v2824_v62  ;;  %v1527_v56 = vsub.f32 %v2827_v23, %v1526_v45 }
 0x1c9   :  { %1431 = vmatpush.msrb.mxu1 %v2607_v10 }
 0x1ca   :  { %1366 = vmatpush.msrb.mxu0 %v1179_v40  ;;  %1499 = vmatpush.msrb.mxu3 %v1498_v6  ;;  %v1504_v40 = vand.u32 4294901760, %v1503_v46  ;;  %v2859_v6 = vand.u32 4294901760, %v1097_v33  ;;  %v1533_v46 = vsub.f32 %v2846_v1, %v3131_v63 }
 0x1cb   :  { %1468 = vmatpush.msrb.mxu2 %v2843_v39  ;;  %1433 = vmatpush.msrb.mxu1 %v2615_v8 }
 0x1cc   :  { %1370 = vmatpush.msrb.mxu0 %v1185_v4  ;;  %1505 = vmatpush.msrb.mxu3 %v1504_v40  ;;  %v1510_v4 = vand.u32 4294901760, %v1509_v53  ;;  %v2875_v40 = vsub.f32 %v1097_v33, %v2859_v6  ;;  %v1095_v53 = vld [vmem:[%s3098_s4 + $0xa8] sm:$0xff]  ;;  %v1534_v36 = vand.u32 4294901760, %v1533_v46 }
 0x1cd   :  { %1470 = vmatpush.msrb.mxu2 %v2859_v6  ;;  %v2886_v30 = vand.u32 4294901760, %v1095_v53  ;;  %1435 = vmatpush.msrb.mxu1 %v2627_v11 }
 0x1ce   :  { %1374 = vmatpush.msrb.mxu0 %v1191_v17  ;;  %1511 = vmatpush.msrb.mxu3 %v1510_v4  ;;  %v1521_v17 = vsub.f32 %v2813_v31, %v1520_v21  ;;  %v3128_v4 = vand.u32 4294901760, %v2875_v40 }
 0x1cf   :  { %1472 = vmatpush.msrb.mxu2 %v2872_v49  ;;  %v2908_v10 = vsub.f32 %v1095_v53, %v2886_v30  ;;  %1437 = vmatpush.msrb.mxu1 %v2642_v50 }
 0x1d0   :  { %1378 = vmatpush.msrb.mxu0 %v1197_v41  ;;  %v1522_v41 = vand.u32 4294901760, %v1521_v17  ;;  %1517 = vmatpush.msrb.mxu3 %v1516_v42  ;;  %v1540_v17 = vand.u32 4294901760, %v1539_v20  ;;  %v1093_v42 = vld [vmem:[%s3098_s4 + $0x98] sm:$0xff] }
 0x1d1   :  { %1474 = vmatpush.msrb.mxu2 %v2886_v30  ;;  %v2921_v34 = vand.u32 4294901760, %v1093_v42  ;;  %1439 = vmatpush.msrb.mxu1 %v2658_v12 }
 0x1d2   :  { %1382 = vmatpush.msrb.mxu0 %v1203_v54  ;;  %v1528_v54 = vand.u32 4294901760, %v1527_v56  ;;  %1523 = vmatpush.msrb.mxu3 %v1522_v41  ;;  %v1551_v41 = vsub.f32 %v2889_v61, %v3127_v43  ;;  %v3126_v56 = vand.u32 4294901760, %v2908_v10 }
 0x1d3   :  { %v2939_v11 = vsub.f32 %v1093_v42, %v2921_v34  ;;  %v2953_v42 = vsub.f32 %v1092_v22, %v2936_v3  ;;  %1441 = vmatpush.msrb.mxu1 %v2672_v28 }
 0x1d4   :  { %1386 = vmatpush.msrb.mxu0 %v1209_v26  ;;  %1529 = vmatpush.msrb.mxu3 %v1528_v54  ;;  %v1545_v26 = vsub.f32 %v2875_v40, %v3128_v4  ;;  %v1552_v54 = vand.u32 4294901760, %v1551_v41  ;;  %v1557_v46 = vsub.f32 %v2908_v10, %v3126_v56 }
 0x1d5   :  { %v3124_v25 = vand.u32 4294901760, %v2953_v42  ;;  %1443 = vmatpush.msrb.mxu1 %v2687_v29 }
 0x1d6   :  { %1390 = vmatpush.msrb.mxu0 %v1215_v60  ;;  %v2905_v60 = vand.u32 4294901760, %v1094_v37  ;;  %1535 = vmatpush.msrb.mxu3 %v1534_v36  ;;  %v1546_v33 = vand.u32 4294901760, %v1545_v26  ;;  %v1558_v26 = vand.u32 4294901760, %v1557_v46 }
 0x1d7   :  { %1445 = vmatpush.msrb.mxu1 %v2702_v59 }
 0x1d8   :  { %1394 = vmatpush.msrb.mxu0 %v1221_v48  ;;  %1476 = vmatpush.msrb.mxu2 %v2905_v60  ;;  %v2927_v8 = vsub.f32 %v1094_v37, %v2905_v60 }
 0x1d9   :  { %1541 = vmatpush.msrb.mxu3 %v1540_v17  ;;  %v3122_v17 = vand.u32 4294901760, %v2939_v11  ;;  %1447 = vmatpush.msrb.mxu1 %v2718_v58 }
 0x1da   :  { %1398 = vmatpush.msrb.mxu0 %v1227_v15  ;;  %1478 = vmatpush.msrb.mxu2 %v2921_v34  ;;  %v1091_v15 = vld [vmem:[%s3098_s4 + $0x88] sm:$0xff]  ;;  %v3125_v53 = vand.u32 4294901760, %v2927_v8  ;;  %s1846_s4 = smov [#allocation2]  }
 0x1db   :  { %1547 = vmatpush.msrb.mxu3 %v1546_v33  ;;  %v2948_v36 = vand.u32 4294901760, %v1091_v15  ;;  %v1569_v33 = vsub.f32 %v2939_v11, %v3122_v17  ;;  %s1801_s16 = sshll.u32 %s1846_s4, 4  ;;  %s1802_s16 = int_to_ptr.vmem [resolvable:$true] %s1801_s16 }
 0x1dc   :  { %1402 = vmatpush.msrb.mxu0 %v1233_v2  ;;  %1480 = vmatpush.msrb.mxu2 %v2936_v3  ;;  %v1563_v50 = vsub.f32 %v2927_v8, %v3125_v53 }
 0x1dd   :  { %1553 = vmatpush.msrb.mxu3 %v1552_v54  ;;  %v2972_v12 = vsub.f32 %v1091_v15, %v2948_v36  ;;  %v1570_v22 = vand.u32 4294901760, %v1569_v33  ;;  %v1575_v54 = vsub.f32 %v2953_v42, %v3124_v25 }
 0x1de   :  { %1406 = vmatpush.msrb.mxu0 %v1239_v52  ;;  %1482 = vmatpush.msrb.mxu2 %v2948_v36  ;;  %v2969_v52 = vand.u32 4294901760, %v1090_v14  ;;  %v1564_v41 = vand.u32 4294901760, %v1563_v50 }
 0x1df   :  { %1559 = vmatpush.msrb.mxu3 %v1558_v26  ;;  %v3123_v46 = vand.u32 4294901760, %v2972_v12  ;;  %v1576_v44 = vand.u32 4294901760, %v1575_v54 }
 0x1e0   :  { %1410 = vmatpush.msrb.mxu0 %v1245_v27  ;;  %1484 = vmatpush.msrb.mxu2 %v2969_v52  ;;  %v2983_v17 = vsub.f32 %v1090_v14, %v2969_v52 }
 0x1e1   :  { %1565 = vmatpush.msrb.mxu3 %v1564_v41  ;;  %v1581_v28 = vsub.f32 %v2972_v12, %v3123_v46 }
 0x1e2   :  { %v3130_v27 = vand.u32 4294901760, %v2983_v17 }
 0x1e3   :  { %1571 = vmatpush.msrb.mxu3 %v1570_v22  ;;  %v1582_v50 = vand.u32 4294901760, %v1581_v28 }
 0x1e4   :  { %v1587_v14 = vsub.f32 %v2983_v17, %v3130_v27 }
 0x1e5   :  { %1577 = vmatpush.msrb.mxu3 %v1576_v44 }
 0x1e6   :  { %v1588_v33 = vand.u32 4294901760, %v1587_v14 }
 0x1e7   :  { %1583 = vmatpush.msrb.mxu3 %v1582_v50 }
 0x1e9   :  { %1589 = vmatpush.msrb.mxu3 %v1588_v33 }
 0x20c   :  { %v824_v48 = vpop.f32.mrf.mxu1 }
 0x214   :  { %v798_v20 = vpop.f32.mrf.mxu0  ;;  %v848_v37 = vpop.f32.mrf.mxu2 }
 0x215   :  { %v918_v15 = vpop.f32.mrf.mxu1  ;;  %v825_v41 = vadd.f32 %v824_v48, %v798_v20  ;;  %v3166_v48 = vld [vmem:[#allocation5_spill] sm:$0xff] }
 0x216   :  { %v872_v2 = vpop.f32.mrf.mxu3 }
 0x217   :  { %v849_v46 = vadd.f32 %v848_v37, %v825_v41 }
 0x219   :  { %v873_v56 = vadd.f32 %v872_v2, %v849_v46 }
 0x21c   :  { %v896_v26 = vpop.f32.mrf.mxu0  ;;  %v944_v29 = vpop.f32.mrf.mxu2 }
 0x21d   :  { %v1018_v53 = vpop.f32.mrf.mxu1  ;;  %v897_v4 = vadd.f32 %v896_v26, %v873_v56 }
 0x21e   :  { %v970_v54 = vpop.f32.mrf.mxu3 }
 0x21f   :  { %v971_v25 = vadd.f32 %v970_v54, %v944_v29  ;;  %v919_v58 = vadd.f32 %v918_v15, %v897_v4 }
 0x224   :  { %v994_v59 = vpop.f32.mrf.mxu0  ;;  %v1042_v43 = vpop.f32.mrf.mxu2 }
 0x225   :  { %v995_v22 = vadd.f32 %v994_v59, %v971_v25 }
 0x226   :  { %v1064_v27 = vpop.f32.mrf.mxu3 }
 0x227   :  { %v1019_v28 = vadd.f32 %v1018_v53, %v995_v22 }
 0x229   :  { %v1043_v16 = vadd.f32 %v1042_v43, %v1019_v28 }
 0x22b   :  { %v1065_v63 = vadd.f32 %v1064_v27, %v1043_v16 }
 0x22d   :  { %v1069_v44 = vrot.slane %v1065_v63, 6 }
 0x22f   :  { %v1071_v14 = vsel %vm1070_vm6, %v919_v58, %v1069_v44 }
 0x230   :  { %v1073_v20 = vmul.f32 %v1071_v14, %v3166_v48 }
 0x232   :  { %1107 = vst [vmem:[#allocation1] ss:$4 sm:$0xff] %v1073_v20 }
 0x239   :  { %v1108_v50 = vld.sshfl [vmem:[#allocation1] sm:$0xff pattern:$0x73625140]  ;;  %v1109_v37 = vld.sshfl [vmem:[#allocation1 + $0x8] sm:$0xff pattern:$0x73625140] }
 0x23a   :  { %v1144_v29 = vand.u32 4294901760, %v1108_v50  ;;  %v2996_v33 = vand.u32 4294901760, %v1109_v37 }
 0x23c   :  { %1250 = vmatmul.f32.vlgmr.msra.gmra.mxu1 %v1144_v29  ;;  %v1145_v2 = vsub.f32 %v1108_v50, %v1144_v29  ;;  %v2999_v53 = vsub.f32 %v1109_v37, %v2996_v33 }
 0x23d   :  { %1650 = vmatpush.msra.mxu1 %v2741_v55 }
 0x23e   :  { %1304 = vmatmul.f32.vlgmr.msra.gmra.mxu2 %v1145_v2  ;;  %v1146_v16 = vand.u32 4294901760, %v1145_v2  ;;  %v1487_v63 = vand.u32 4294901760, %v2999_v53 }
 0x23f   :  { %1652 = vmatpush.msra.mxu1 %v2755_v18  ;;  %1691 = vmatpush.msra.mxu2 %v1496_v7 }
 0x240   :  { %1343 = vmatmul.f32.vlgmr.msra.gmra.mxu3 %v1146_v16  ;;  %v1147_v4 = vsub.f32 %v1145_v2, %v1146_v16  ;;  %v1488_v43 = vsub.f32 %v2999_v53, %v1487_v63 }
 0x241   :  { %1654 = vmatpush.msra.mxu1 %v2764_v38  ;;  %1695 = vmatpush.msra.mxu2 %v1502_v35  ;;  %v3172_v35 = vand.u32 4294901760, %v2927_v8 }
 0x242   :  { %1758 = vmatpush.msra.mxu3 %v2741_v55  ;;  %v1148_v56 = vand.u32 4294901760, %v1147_v4  ;;  %v1489_v7 = vand.u32 4294901760, %v1488_v43  ;;  %v3167_v55 = vand.u32 4294901760, %v2846_v1 }
 0x243   :  { %1656 = vmatpush.msra.mxu1 %v2779_v24  ;;  %1699 = vmatpush.msra.mxu2 %v1508_v19  ;;  %v3175_v19 = vand.u32 4294901760, %v2972_v12 }
 0x244   :  { %1760 = vmatpush.msra.mxu3 %v2755_v18  ;;  %1149 = vmatmul.f32.vlgmr.msra.gmra.mxu0 %v1148_v56  ;;  %v3169_v18 = vand.u32 4294901760, %v2875_v40 }
 0x245   :  { %1449 = vmatmul.f32.vlgmr.msrb.gmra.mxu1 %v1144_v29  ;;  %1597 = vmatpush.msra.mxu0 %v2753_v32  ;;  %v3168_v32 = vand.u32 4294901760, %v2863_v13 }
 0x246   :  { %1658 = vmatpush.msra.mxu1 %v2795_v9  ;;  %1703 = vmatpush.msra.mxu2 %v1514_v51 }
 0x247   :  { %1762 = vmatpush.msra.mxu3 %v2764_v38  ;;  %1490 = vmatmul.f32.vlgmr.msrb.gmra.mxu2 %v1489_v7  ;;  %v3170_v38 = vand.u32 4294901760, %v2889_v61 }
 0x248   :  { %1600 = vmatpush.msra.mxu0 %v2767_v5  ;;  %1660 = vmatpush.msra.mxu1 %v2810_v0  ;;  %v3171_v5 = vand.u32 4294901760, %v2908_v10 }
 0x249   :  { %1707 = vmatpush.msra.mxu2 %v1520_v21  ;;  %1764 = vmatpush.msra.mxu3 %v2779_v24  ;;  %v3173_v24 = vand.u32 4294901760, %v2939_v11 }
 0x24a   :  { %1591 = vmatmul.f32.vlgmr.msrb.gmra.mxu3 %v2996_v33  ;;  %1603 = vmatpush.msra.mxu0 %v2782_v47  ;;  %v3174_v47 = vand.u32 4294901760, %v2953_v42 }
 0x24b   :  { %1662 = vmatpush.msra.mxu1 %v2824_v62  ;;  %1711 = vmatpush.msra.mxu2 %v1526_v45 }
 0x24c   :  { %1766 = vmatpush.msra.mxu3 %v2795_v9  ;;  %1606 = vmatpush.msra.mxu0 %v2799_v57  ;;  %v3176_v9 = vand.u32 4294901760, %v2983_v17 }
 0x24d   :  { %1664 = vmatpush.msra.mxu1 %v2843_v39  ;;  %1715 = vmatpush.msra.mxu2 %v3167_v55 }
 0x24e   :  { %1768 = vmatpush.msra.mxu3 %v2810_v0  ;;  %1412 = vmatmul.f32.vlgmr.msrb.gmra.mxu0 %v1144_v29 }
 0x24f   :  { %1609 = vmatpush.msra.mxu0 %v2813_v31  ;;  %1666 = vmatpush.msra.mxu1 %v2859_v6 }
 0x250   :  { %1719 = vmatpush.msra.mxu2 %v3168_v32  ;;  %1770 = vmatpush.msra.mxu3 %v2824_v62 }
 0x251   :  { %1612 = vmatpush.msra.mxu0 %v2827_v23  ;;  %1668 = vmatpush.msra.mxu1 %v2872_v49 }
 0x252   :  { %1723 = vmatpush.msra.mxu2 %v3169_v18  ;;  %1772 = vmatpush.msra.mxu3 %v2843_v39 }
 0x253   :  { %1615 = vmatpush.msra.mxu0 %v2846_v1  ;;  %1670 = vmatpush.msra.mxu1 %v2886_v30 }
 0x254   :  { %1727 = vmatpush.msra.mxu2 %v3170_v38  ;;  %1774 = vmatpush.msra.mxu3 %v2859_v6 }
 0x255   :  { %1618 = vmatpush.msra.mxu0 %v2863_v13  ;;  %1672 = vmatpush.msra.mxu1 %v2905_v60 }
 0x256   :  { %1731 = vmatpush.msra.mxu2 %v3171_v5  ;;  %1776 = vmatpush.msra.mxu3 %v2872_v49 }
 0x257   :  { %1621 = vmatpush.msra.mxu0 %v2875_v40  ;;  %1674 = vmatpush.msra.mxu1 %v2921_v34 }
 0x258   :  { %1735 = vmatpush.msra.mxu2 %v3172_v35  ;;  %1778 = vmatpush.msra.mxu3 %v2886_v30 }
 0x259   :  { %1624 = vmatpush.msra.mxu0 %v2889_v61  ;;  %1676 = vmatpush.msra.mxu1 %v2936_v3 }
 0x25a   :  { %1739 = vmatpush.msra.mxu2 %v3173_v24  ;;  %1780 = vmatpush.msra.mxu3 %v2905_v60 }
 0x25b   :  { %1627 = vmatpush.msra.mxu0 %v2908_v10  ;;  %1678 = vmatpush.msra.mxu1 %v2948_v36 }
 0x25c   :  { %1743 = vmatpush.msra.mxu2 %v3174_v47  ;;  %1782 = vmatpush.msra.mxu3 %v2921_v34 }
 0x25d   :  { %1630 = vmatpush.msra.mxu0 %v2927_v8  ;;  %1680 = vmatpush.msra.mxu1 %v2969_v52 }
 0x25e   :  { %1747 = vmatpush.msra.mxu2 %v3175_v19  ;;  %1784 = vmatpush.msra.mxu3 %v2936_v3 }
 0x25f   :  { %1684 = vmatmul.f32.vlgmr.msra.gmra.mxu1 %v1487_v63  ;;  %1633 = vmatpush.msra.mxu0 %v2939_v11 }
 0x260   :  { %1751 = vmatpush.msra.mxu2 %v3176_v9  ;;  %1786 = vmatpush.msra.mxu3 %v2948_v36 }
 0x261   :  { %1753 = vmatmul.f32.vlgmr.msra.gmra.mxu2 %v2996_v33  ;;  %1636 = vmatpush.msra.mxu0 %v2953_v42 }
 0x262   :  { %1788 = vmatpush.msra.mxu3 %v2969_v52 }
 0x263   :  { %1790 = vmatmul.f32.vlgmr.msra.gmra.mxu3 %v2996_v33  ;;  %1639 = vmatpush.msra.mxu0 %v2972_v12 }
 0x265   :  { %1642 = vmatpush.msra.mxu0 %v2983_v17 }
 0x266   :  { %1645 = vmatmul.f32.vlgmr.msra.gmra.mxu0 %v2999_v53 }
 0x2b9   :  { %v1251_v0 = vpop.f32.mrf.mxu1 }
 0x2c1   :  { %v1150_v57 = vpop.f32.mrf.mxu0  ;;  %v1305_v51 = vpop.f32.mrf.mxu2 }
 0x2c2   :  { %v1252_v31 = vadd.f32 %v1251_v0, %v1150_v57  ;;  %v1450_v1 = vpop.f32.mrf.mxu1 }
 0x2c3   :  { %v1344_v62 = vpop.f32.mrf.mxu3 }
 0x2c4   :  { %v1306_v21 = vadd.f32 %v1305_v51, %v1252_v31 }
 0x2c6   :  { %v1345_v45 = vadd.f32 %v1344_v62, %v1306_v21 }
 0x2ca   :  { %v1491_v13 = vpop.f32.mrf.mxu2 }
 0x2cb   :  { %v1413_v23 = vpop.f32.mrf.mxu0 }
 0x2cc   :  { %v1414_v39 = vadd.f32 %v1413_v23, %v1345_v45 }
 0x2cd   :  { %v1592_v40 = vpop.f32.mrf.mxu3 }
 0x2ce   :  { %v1451_v6 = vadd.f32 %v1450_v1, %v1414_v39 }
 0x2d0   :  { %v1492_v49 = vadd.f32 %v1491_v13, %v1451_v6 }
 0x2d2   :  { %v1593_v30 = vadd.f32 %v1592_v40, %v1492_v49 }
 0x2dc   :  { %v1685_v10 = vpop.f32.mrf.mxu1 }
 0x2e3   :  { %v1646_v61 = vpop.f32.mrf.mxu0 }
 0x2e4   :  { %v1647_v60 = vadd.f32 %v1646_v61, %v1593_v30  ;;  %v1754_v8 = vpop.f32.mrf.mxu2 }
 0x2e6   :  { %v1686_v34 = vadd.f32 %v1685_v10, %v1647_v60  ;;  %v1791_v11 = vpop.f32.mrf.mxu3 }
 0x2e8   :  { %v1755_v3 = vadd.f32 %v1754_v8, %v1686_v34 }
 0x2ea   :  { %v1792_v36 = vadd.f32 %v1791_v11, %v1755_v3 }
 0x2ec   :  { %1795 = vst.msk [vmem:[#allocation2] sm:$0x3] %vm1794_vm7, %v1792_v36 }
 0x2ed   :  { %1806 = dma.vmem_to_hbm [thread:$0]  %s1802_s16, 32, %s1804_s19, [#allocation3]  }
 0x2ee   :  { %1844 = dma.done.wait [#allocation3], 32  }
 0x2ef   :  { %1845 = vsyncadd [#allocation3], 4294967264 }
 0x2f0   :  { %1811 = vsyncpa [#allocation3], 1 }

</bundles_post_ra>
